<compile_context>
chip_gen: v7x
topology: tpu7x:2x2x1
jax: 0.10.0
libtpu: 0.0.40
codegen_flags: <defaults>
</compile_context>

<pallas_src>
import jax
import jax.numpy as jnp
import numpy as np
from jax.experimental import pallas as pl
from jax.experimental.pallas import tpu as pltpu

HOPS = 6
LANE = 128
SUBLANE = 8
NEG_INF = -1e30


def _round_up(x, m):
    return (x + m - 1) // m * m


def _pad2(a, rows, cols):
    return jnp.pad(a, ((0, rows - a.shape[0]), (0, cols - a.shape[1])))


# ----------------------------------------------------------------------------
# Kernel
# ----------------------------------------------------------------------------
def memnet_kernel(mem_ref, asp_ref, msk_ref,
                  wk_ref, bk_ref, wak_ref, wsq_ref, bsq_ref,
                  whop_ref, bpx_ref, wd_ref, bd_ref,
                  out_ref):
    TB, L, D = mem_ref.shape

    # Hop-invariant key projection: one [TB*L, D] @ [D, D] bf16 MXU matmul,
    # f32 accumulation.
    mem2d = mem_ref[...].reshape(TB * L, D)
    kx_f32 = jnp.dot(mem2d, wk_ref[...],
                     preferred_element_type=jnp.float32).reshape(TB, L, D)
    kx_f32 = kx_f32 + bk_ref[...]                            # [TB, L, D] f32

    # Key half of the MLP attention score (hop-invariant): VPU mul + lane
    # reduce (an MXU matmul with N=1 would waste a full result tile).
    s_k = jnp.sum(kx_f32 * wak_ref[...], axis=-1)            # [TB, L] f32
    # bf16 copy of kx used inside the hop loop (halves VMEM + load bandwidth).
    kx = kx_f32.astype(jnp.bfloat16)                         # [TB, L, D] bf16

    # Constants hoisted out of the (unrolled) hop loop — JAX does not CSE
    # broadcast_in_dim, so do each load / broadcast exactly once.
    valid = msk_ref[...] > 0.5                               # [1, L]  batch-max mask
    wsq = wsq_ref[...]                                       # [1, D]  folded wq@waq
    bsq = bsq_ref[...]                                       # [1, 1]  folded bq@waq
    whop = whop_ref[...]                                     # [2D, D] bf16 [[wproj],[wx]]
    bpx = jnp.broadcast_to(bpx_ref[...], (TB, D))            # [TB, D] bproj + bx
    x0 = asp_ref[...]                                        # [TB, D] f32 query seed

    def hop(_, x):
        # Folded query projection (VPU): s_q = x @ (wq@waq) + bq@waq.
        s_q = jnp.sum(x * wsq, axis=-1, keepdims=True) + bsq          # [TB, 1]
        score = jnp.tanh(s_k + s_q)                                   # [TB, L]
        # Softmax over key positions; positions beyond the batch max length
        # are excluded (SqueezeEmbedding truncation semantics), in f32.
        score = jnp.where(valid, score, NEG_INF)
        score = score - jnp.max(score, axis=-1, keepdims=True)
        e = jnp.exp(score)
        p = e / jnp.sum(e, axis=-1, keepdims=True)                    # [TB, L] f32
        att = jnp.sum(p[:, :, None] * kx, axis=1)                     # [TB, D] f32 acc
        # Fused residual hop update: [att | x] @ [[wproj],[wx]] + (bproj + bx),
        # bf16 inputs / f32 accumulate on the MXU.
        ax = jnp.concatenate([att, x], axis=-1).astype(jnp.bfloat16)  # [TB, 2D]
        return jnp.dot(ax, whop, preferred_element_type=jnp.float32) + bpx

    # Hops are serially dependent; unroll so the LLO scheduler can interleave.
    x = jax.lax.fori_loop(0, HOPS, hop, x0, unroll=True)

    # Final dense: bf16 inputs / f32 accumulate, lane-dense [TB, Cp] store.
    out_ref[...] = (jnp.dot(x.astype(jnp.bfloat16), wd_ref[...],
                            preferred_element_type=jnp.float32) + bd_ref[...])


# ----------------------------------------------------------------------------
# Wrapper: chip-aware tiling, padding, weight folding, pallas_call
# ----------------------------------------------------------------------------
def memnet_pallas(memory, aspect, memory_len, params, *, max_tb=None):
    """memory: [B, L, D] f32, aspect: [B, D] f32, memory_len: [B] int32."""
    B, L, D = memory.shape
    C = params['wd'].shape[1]

    Dp = _round_up(D, LANE)
    Lp = _round_up(L, SUBLANE)
    Cp = _round_up(C, LANE)

    # ---- generation-aware batch tile / VMEM budget --------------------------
    try:
        kind = jax.devices()[0].device_kind.lower()
    except Exception:                                   # pragma: no cover
        kind = ""
    is_v5 = "v5" in kind
    is_v7 = ("v7" in kind) or ("7x" in kind)
    # v5e MXU is 4x128x128 (M=128 already fills it); v6e/v7x are 2x256x256.
    tb_target = max_tb if max_tb is not None else (128 if is_v5 else 256)
    # v7x has 64 MiB physical VMEM; v5e/v6e have 128 MiB.
    vmem_budget = (44 << 20) if is_v7 else (100 << 20)

    TB = _round_up(min(tb_target, _round_up(B, SUBLANE)), SUBLANE)
    if is_v7:
        # Keep >= 2 grid steps (when the batch allows) so both TCs get work.
        half = max(SUBLANE, _round_up(_round_up(B, SUBLANE) // 2, SUBLANE))
        TB = min(TB, half)

    def est_vmem(tb):
        streamed = 2 * (tb * Lp * Dp * 2 + tb * Dp * 4 + tb * Cp * 4)  # dbl-buffered I/O
        weights = 2 * (3 * Dp * Dp * 2 + Dp * Cp * 2 + 8 * Dp * 4)     # dbl-buffered consts
        temps = (tb * Lp * Dp * (4 + 2)        # kx f32 + kx bf16
                 + tb * Lp * Dp * 4            # headroom for a broadcast temp
                 + 6 * tb * Dp * 4 + 4 * tb * Lp * 4)
        return streamed + weights + temps

    while TB > SUBLANE and est_vmem(TB) > vmem_budget:
        TB = max(SUBLANE, _round_up(TB // 2, SUBLANE))
    Bp = _round_up(B, TB)

    f32, bf16 = jnp.float32, jnp.bfloat16
    # ---- fold / pad / cast parameters (tiny, traced once per call) ----------
    wk = _pad2(params['wk'], Dp, Dp).astype(bf16)
    bk = _pad2(params['bk'], 1, Dp).astype(f32)
    wak = _pad2(params['wak'].T, 1, Dp).astype(f32)                    # [1, Dp]
    w_sq = _pad2((params['wq'] @ params['waq']).T, 1, Dp).astype(f32)  # wq@waq
    b_sq = (params['bq'] @ params['waq']).reshape(1, 1).astype(f32)    # bq@waq
    whop = jnp.concatenate([_pad2(params['wproj'], Dp, Dp),
                            _pad2(params['wx'], Dp, Dp)], axis=0).astype(bf16)
    bpx = _pad2(params['bproj'] + params['bx'], 1, Dp).astype(f32)
    wd = _pad2(params['wd'], Dp, Cp).astype(bf16)
    bd = _pad2(params['bd'], 1, Cp).astype(f32)

    # ---- pad / cast activations (memory streamed bf16, aspect kept f32) -----
    mem = jnp.pad(memory, ((0, Bp - B), (0, Lp - L), (0, Dp - D))).astype(bf16)
    asp = jnp.pad(aspect, ((0, Bp - B), (0, Dp - D))).astype(f32)
    max_len = jnp.max(memory_len)
    mask = (jnp.arange(Lp)[None, :] < max_len).astype(f32)             # [1, Lp]

    def const(shape):
        zeros = (0,) * len(shape)
        return pl.BlockSpec(shape, lambda b: zeros)

    in_specs = [
        pl.BlockSpec((TB, Lp, Dp), lambda b: (b, 0, 0)),    # memory (bf16 stream)
        pl.BlockSpec((TB, Dp), lambda b: (b, 0)),           # aspect / query seed (f32)
        const((1, Lp)),                                     # valid-position mask
        const((Dp, Dp)), const((1, Dp)),                    # wk (bf16), bk
        const((1, Dp)),                                     # wak (key-score row)
        const((1, Dp)), const((1, 1)),                      # folded wq@waq, bq@waq
        const((2 * Dp, Dp)), const((1, Dp)),                # stacked [wproj;wx], bproj+bx
        const((Dp, Cp)), const((1, Cp)),                    # wd (bf16), bd
    ]

    vmem_limit = int(min(vmem_budget, max(32 << 20, 2 * est_vmem(TB))))

    out = pl.pallas_call(
        memnet_kernel,
        out_shape=jax.ShapeDtypeStruct((Bp, Cp), jnp.float32),
        grid=(Bp // TB,),
        in_specs=in_specs,
        out_specs=pl.BlockSpec((TB, Cp), lambda b: (b, 0)),
        compiler_params=pltpu.CompilerParams(
            # disjoint output blocks per step -> safe; lets v7x use both TCs
            dimension_semantics=("parallel",),
            vmem_limit_bytes=vmem_limit,
        ),
    )(mem, asp, mask, wk, bk, wak, w_sq, b_sq, whop, bpx, wd, bd)

    return out[:B, :C]


# ----------------------------------------------------------------------------
# Plain-JAX glue (embedding gathers / aspect mean) + full forward
# ----------------------------------------------------------------------------
def _prepare(params, x_idx, y_idx):
    memory_len = jnp.sum(x_idx != 0, axis=-1)                         # [B] int32
    aspect_len = jnp.sum(y_idx != 0, axis=-1).astype(jnp.float32)     # [B]

    memory = params['embed'][x_idx]                                   # [B, L, D]
    L = x_idx.shape[1]
    keep = (jnp.arange(L)[None, :] < memory_len[:, None]).astype(memory.dtype)
    memory = memory * keep[:, :, None]           # zero embeddings of pad tokens

    aspect = params['embed'][y_idx]                                   # [B, La, D]
    aspect = jnp.sum(aspect, axis=1) / aspect_len[:, None]            # [B, D]
    return memory, aspect, memory_len


def memnet_forward(params, x_idx, y_idx):
    memory, aspect, memory_len = _prepare(params, x_idx, y_idx)
    return memnet_pallas(memory, aspect, memory_len, params)


# ----------------------------------------------------------------------------
# Pure-JAX reference (mirrors the PyTorch forward, un-folded; mirrors the
# kernel's bf16 boundary quantization of memory/wk/wproj/wx/wd, the bf16 kx
# copy used in the weighted sum and the bf16 matmul-input casts, so the
# comparison is tight. These bf16 casts are a deliberate, documented deviation
# from the f32 PyTorch model.)
# ----------------------------------------------------------------------------
def memnet_reference(params, x_idx, y_idx):
    memory, aspect, memory_len = _prepare(params, x_idx, y_idx)
    q = lambda a: a.astype(jnp.bfloat16).astype(jnp.float32)
    memory, wk = q(memory), q(params['wk'])
    wproj, wx, wd = q(params['wproj']), q(params['wx']), q(params['wd'])
    L = memory.shape[1]
    valid = jnp.arange(L)[None, :, None] < jnp.max(memory_len)        # [1, L, 1]

    with jax.default_matmul_precision('float32'):
        kx = memory @ wk + params['bk']                               # [B, L, D] f32
        kx_b = q(kx)                       # bf16-rounded copy (weighted sum)
        x = aspect                                                    # [B, D] f32
        for _ in range(HOPS):
            lin = q(x) @ wx + params['bx']                            # [B, D]
            qx = x @ params['wq'] + params['bq']                      # [B, D]
            score = jnp.tanh(kx @ params['wak']
                             + (qx @ params['waq'])[:, None, :])      # [B, L, 1]
            score = jnp.where(valid, score, NEG_INF)
            p = jax.nn.softmax(score, axis=1)
            att = jnp.sum(p * kx_b, axis=1)                           # [B, D]
            att = q(att) @ wproj + params['bproj']
            x = att + lin
        return q(x) @ wd + params['bd']


def init_params(key, vocab_size, embedding_dim, class_num):
    D, C = embedding_dim, class_num
    ks = jax.random.split(key, 14)
    s = 0.1
    n = lambda k, shape: jax.random.normal(k, shape, jnp.float32) * s
    return {
        'embed': n(ks[0], (vocab_size, D)),
        'wk':    n(ks[1], (D, D)), 'bk':  n(ks[2], (1, D)),
        'wq':    n(ks[3], (D, D)), 'bq':  n(ks[4], (1, D)),
        'wak':   n(ks[5], (D, 1)),                 # attention weight, key half
        'waq':   n(ks[6], (D, 1)),                 # attention weight, query half
        'wproj': n(ks[7], (D, D)), 'bproj': n(ks[8], (1, D)),
        'wx':    n(ks[9], (D, D)), 'bx':  n(ks[10], (1, D)),
        'wd':    n(ks[11], (D, C)), 'bd': n(ks[12], (1, C)),
    }


if __name__ == "__main__":
    vocab_size, embedding_dim, class_num = 50, 32, 3
    B, L, La = 2, 8, 4

    key = jax.random.PRNGKey(0)
    pk, xk, yk = jax.random.split(key, 3)
    params = init_params(pk, vocab_size, embedding_dim, class_num)

    # Token index inputs (0 == padding); ensure every row has >= 1 token.
    x_idx = jax.random.randint(xk, (B, L), 1, vocab_size, dtype=jnp.int32)
    x_idx = x_idx.at[1, 6:].set(0)          # second text sequence is padded
    y_idx = jax.random.randint(yk, (B, La), 1, vocab_size, dtype=jnp.int32)
    y_idx = y_idx.at[1, 3:].set(0)          # second aspect is padded

    fwd = jax.jit(memnet_forward)           # static shapes -> no recompiles
    out = jax.block_until_ready(fwd(params, x_idx, y_idx))

    ref = memnet_reference(params, x_idx, y_idx)
    assert out.shape == (B, class_num)
    assert np.allclose(np.asarray(out), np.asarray(ref), rtol=3e-3, atol=3e-3), (
        np.asarray(out), np.asarray(ref))
    print("KERNEL_OK")
</pallas_src>

<mosaic_0001>
module attributes {stable_mosaic.version = 11 : i64} {
  func.func @memnet_kernel(%arg0: i32, %arg1: memref<8x8x128xbf16, #tpu.memory_space<vmem>>, %arg2: memref<8x128xf32, #tpu.memory_space<vmem>>, %arg3: memref<1x8xf32, #tpu.memory_space<vmem>>, %arg4: memref<128x128xbf16, #tpu.memory_space<vmem>>, %arg5: memref<1x128xf32, #tpu.memory_space<vmem>>, %arg6: memref<1x128xf32, #tpu.memory_space<vmem>>, %arg7: memref<1x128xf32, #tpu.memory_space<vmem>>, %arg8: memref<1x1xf32, #tpu.memory_space<vmem>>, %arg9: memref<256x128xbf16, #tpu.memory_space<vmem>>, %arg10: memref<1x128xf32, #tpu.memory_space<vmem>>, %arg11: memref<128x128xbf16, #tpu.memory_space<vmem>>, %arg12: memref<1x128xf32, #tpu.memory_space<vmem>>, %arg13: memref<8x128xf32, #tpu.memory_space<vmem>>) attributes {dimension_semantics = [#tpu.dimension_semantics<parallel>], iteration_bounds = array<i64: 1>, scalar_prefetch = 0 : i64, scratch_operands = 0 : i64, tpu.core_type = #tpu.core_type<tc>, window_params = [{transform_indices = @transform_0, window_bounds = array<i64: 8, 8, 128>}, {transform_indices = @transform_1, window_bounds = array<i64: 8, 128>}, {pipeline_mode = #tpu.pipeline_mode<synchronous>, transform_indices = @transform_2, window_bounds = array<i64: 1, 8>}, {pipeline_mode = #tpu.pipeline_mode<synchronous>, transform_indices = @transform_3, window_bounds = array<i64: 128, 128>}, {pipeline_mode = #tpu.pipeline_mode<synchronous>, transform_indices = @transform_4, window_bounds = array<i64: 1, 128>}, {pipeline_mode = #tpu.pipeline_mode<synchronous>, transform_indices = @transform_5, window_bounds = array<i64: 1, 128>}, {pipeline_mode = #tpu.pipeline_mode<synchronous>, transform_indices = @transform_6, window_bounds = array<i64: 1, 128>}, {pipeline_mode = #tpu.pipeline_mode<synchronous>, transform_indices = @transform_7, window_bounds = array<i64: 1, 1>}, {pipeline_mode = #tpu.pipeline_mode<synchronous>, transform_indices = @transform_8, window_bounds = array<i64: 256, 128>}, {pipeline_mode = #tpu.pipeline_mode<synchronous>, transform_indices = @transform_9, window_bounds = array<i64: 1, 128>}, {pipeline_mode = #tpu.pipeline_mode<synchronous>, transform_indices = @transform_10, window_bounds = array<i64: 128, 128>}, {pipeline_mode = #tpu.pipeline_mode<synchronous>, transform_indices = @transform_11, window_bounds = array<i64: 1, 128>}, {transform_indices = @transform_12, window_bounds = array<i64: 8, 128>}]} {
    %c0 = arith.constant 0 : index
    %c0_0 = arith.constant 0 : index
    %c0_1 = arith.constant 0 : index
    %0 = vector.load %arg1[%c0, %c0_0, %c0_1] : memref<8x8x128xbf16, #tpu.memory_space<vmem>>, vector<8x8x128xbf16>
    %1 = vector.shape_cast %0 : vector<8x8x128xbf16> to vector<64x128xbf16>
    %c0_2 = arith.constant 0 : index
    %c0_3 = arith.constant 0 : index
    %2 = vector.load %arg4[%c0_2, %c0_3] : memref<128x128xbf16, #tpu.memory_space<vmem>>, vector<128x128xbf16>
    %cst = arith.constant dense<0.000000e+00> : vector<64x128xf32>
    %3 = tpu.matmul %1, %2, %cst {dimension_numbers = #tpu.dot_dimension_numbers<[1], [0], [0], [1], [0, 0, 1, 1], [], []>} : vector<64x128xbf16>, vector<128x128xbf16>, vector<64x128xf32> -> vector<64x128xf32>
    %4 = vector.shape_cast %3 : vector<64x128xf32> to vector<8x8x128xf32>
    %c0_4 = arith.constant 0 : index
    %c0_5 = arith.constant 0 : index
    %5 = vector.load %arg5[%c0_4, %c0_5] : memref<1x128xf32, #tpu.memory_space<vmem>>, vector<1x128xf32>
    %6 = vector.shape_cast %5 : vector<1x128xf32> to vector<1x1x128xf32>
    %7 = vector.broadcast %6 : vector<1x1x128xf32> to vector<8x8x128xf32>
    %8 = arith.addf %4, %7 : vector<8x8x128xf32>
    %c0_6 = arith.constant 0 : index
    %c0_7 = arith.constant 0 : index
    %9 = vector.load %arg6[%c0_6, %c0_7] : memref<1x128xf32, #tpu.memory_space<vmem>>, vector<1x128xf32>
    %10 = vector.shape_cast %9 : vector<1x128xf32> to vector<1x1x128xf32>
    %11 = vector.broadcast %10 : vector<1x1x128xf32> to vector<8x8x128xf32>
    %12 = arith.mulf %8, %11 : vector<8x8x128xf32>
    %cst_8 = arith.constant dense<0.000000e+00> : vector<8x8xf32>
    %13 = vector.multi_reduction <add>, %12, %cst_8 [2] : vector<8x8x128xf32> to vector<8x8xf32>
    %14 = arith.truncf %8 : vector<8x8x128xf32> to vector<8x8x128xbf16>
    %c0_9 = arith.constant 0 : index
    %c0_10 = arith.constant 0 : index
    %15 = vector.load %arg3[%c0_9, %c0_10] : memref<1x8xf32, #tpu.memory_space<vmem>>, vector<1x8xf32>
    %cst_11 = arith.constant 5.000000e-01 : f32
    %16 = vector.broadcast %cst_11 : f32 to vector<1x8xf32>
    %17 = arith.cmpf ogt, %15, %16 : vector<1x8xf32>
    %c0_12 = arith.constant 0 : index
    %c0_13 = arith.constant 0 : index
    %18 = vector.load %arg7[%c0_12, %c0_13] : memref<1x128xf32, #tpu.memory_space<vmem>>, vector<1x128xf32>
    %c0_14 = arith.constant 0 : index
    %c0_15 = arith.constant 0 : index
    %19 = vector.load %arg8[%c0_14, %c0_15] : memref<1x1xf32, #tpu.memory_space<vmem>>, vector<1x1xf32>
    %c0_16 = arith.constant 0 : index
    %c0_17 = arith.constant 0 : index
    %20 = vector.load %arg9[%c0_16, %c0_17] : memref<256x128xbf16, #tpu.memory_space<vmem>>, vector<256x128xbf16>
    %c0_18 = arith.constant 0 : index
    %c0_19 = arith.constant 0 : index
    %21 = vector.load %arg10[%c0_18, %c0_19] : memref<1x128xf32, #tpu.memory_space<vmem>>, vector<1x128xf32>
    %22 = vector.shape_cast %21 : vector<1x128xf32> to vector<1x128xf32>
    %23 = vector.broadcast %22 : vector<1x128xf32> to vector<8x128xf32>
    %c0_20 = arith.constant 0 : index
    %c0_21 = arith.constant 0 : index
    %24 = vector.load %arg2[%c0_20, %c0_21] : memref<8x128xf32, #tpu.memory_space<vmem>>, vector<8x128xf32>
    %c0_i32 = arith.constant 0 : i32
    %25 = vector.broadcast %18 : vector<1x128xf32> to vector<8x128xf32>
    %26 = arith.mulf %24, %25 : vector<8x128xf32>
    %cst_22 = arith.constant dense<0.000000e+00> : vector<8xf32>
    %27 = vector.multi_reduction <add>, %26, %cst_22 [1] : vector<8x128xf32> to vector<8xf32>
    %28 = vector.shape_cast %27 : vector<8xf32> to vector<8x1xf32>
    %29 = vector.broadcast %19 : vector<1x1xf32> to vector<8x1xf32>
    %30 = arith.addf %28, %29 : vector<8x1xf32>
    %31 = vector.broadcast %30 : vector<8x1xf32> to vector<8x8xf32>
    %32 = arith.addf %13, %31 : vector<8x8xf32>
    %33 = math.tanh %32 : vector<8x8xf32>
    %cst_23 = arith.constant -1.000000e+30 : f32
    %34 = vector.shape_cast %17 : vector<1x8xi1> to vector<1x8xi1>
    %35 = vector.broadcast %34 : vector<1x8xi1> to vector<8x8xi1>
    %36 = vector.broadcast %cst_23 : f32 to vector<8x8xf32>
    %37 = arith.select %35, %33, %36 : vector<8x8xi1>, vector<8x8xf32>
    %cst_24 = arith.constant dense<0xFF800000> : vector<8xf32>
    %38 = vector.multi_reduction <maximumf>, %37, %cst_24 [1] : vector<8x8xf32> to vector<8xf32>
    %39 = vector.shape_cast %38 : vector<8xf32> to vector<8x1xf32>
    %40 = vector.broadcast %39 : vector<8x1xf32> to vector<8x8xf32>
    %41 = arith.subf %37, %40 : vector<8x8xf32>
    %42 = math.exp %41 : vector<8x8xf32>
    %cst_25 = arith.constant dense<0.000000e+00> : vector<8xf32>
    %43 = vector.multi_reduction <add>, %42, %cst_25 [1] : vector<8x8xf32> to vector<8xf32>
    %44 = vector.shape_cast %43 : vector<8xf32> to vector<8x1xf32>
    %45 = vector.broadcast %44 : vector<8x1xf32> to vector<8x8xf32>
    %46 = arith.divf %42, %45 : vector<8x8xf32>
    %47 = vector.shape_cast %46 : vector<8x8xf32> to vector<8x8x1xf32>
    %48 = arith.extf %14 : vector<8x8x128xbf16> to vector<8x8x128xf32>
    %49 = vector.broadcast %47 : vector<8x8x1xf32> to vector<8x8x128xf32>
    %50 = arith.mulf %49, %48 : vector<8x8x128xf32>
    %cst_26 = arith.constant dense<0.000000e+00> : vector<8x128xf32>
    %51 = vector.multi_reduction <add>, %50, %cst_26 [1] : vector<8x8x128xf32> to vector<8x128xf32>
    %52 = tpu.concatenate %51, %24 in 1 : vector<8x128xf32>, vector<8x128xf32> -> vector<8x256xf32>
    %53 = arith.truncf %52 : vector<8x256xf32> to vector<8x256xbf16>
    %cst_27 = arith.constant dense<0.000000e+00> : vector<8x128xf32>
    %54 = tpu.matmul %53, %20, %cst_27 {dimension_numbers = #tpu.dot_dimension_numbers<[1], [0], [0], [1], [0, 0, 1, 1], [], []>} : vector<8x256xbf16>, vector<256x128xbf16>, vector<8x128xf32> -> vector<8x128xf32>
    %55 = arith.addf %54, %23 : vector<8x128xf32>
    %c1_i32 = arith.constant 1 : i32
    %56 = vector.broadcast %18 : vector<1x128xf32> to vector<8x128xf32>
    %57 = arith.mulf %55, %56 : vector<8x128xf32>
    %cst_28 = arith.constant dense<0.000000e+00> : vector<8xf32>
    %58 = vector.multi_reduction <add>, %57, %cst_28 [1] : vector<8x128xf32> to vector<8xf32>
    %59 = vector.shape_cast %58 : vector<8xf32> to vector<8x1xf32>
    %60 = vector.broadcast %19 : vector<1x1xf32> to vector<8x1xf32>
    %61 = arith.addf %59, %60 : vector<8x1xf32>
    %62 = vector.broadcast %61 : vector<8x1xf32> to vector<8x8xf32>
    %63 = arith.addf %13, %62 : vector<8x8xf32>
    %64 = math.tanh %63 : vector<8x8xf32>
    %cst_29 = arith.constant -1.000000e+30 : f32
    %65 = vector.shape_cast %17 : vector<1x8xi1> to vector<1x8xi1>
    %66 = vector.broadcast %65 : vector<1x8xi1> to vector<8x8xi1>
    %67 = vector.broadcast %cst_29 : f32 to vector<8x8xf32>
    %68 = arith.select %66, %64, %67 : vector<8x8xi1>, vector<8x8xf32>
    %cst_30 = arith.constant dense<0xFF800000> : vector<8xf32>
    %69 = vector.multi_reduction <maximumf>, %68, %cst_30 [1] : vector<8x8xf32> to vector<8xf32>
    %70 = vector.shape_cast %69 : vector<8xf32> to vector<8x1xf32>
    %71 = vector.broadcast %70 : vector<8x1xf32> to vector<8x8xf32>
    %72 = arith.subf %68, %71 : vector<8x8xf32>
    %73 = math.exp %72 : vector<8x8xf32>
    %cst_31 = arith.constant dense<0.000000e+00> : vector<8xf32>
    %74 = vector.multi_reduction <add>, %73, %cst_31 [1] : vector<8x8xf32> to vector<8xf32>
    %75 = vector.shape_cast %74 : vector<8xf32> to vector<8x1xf32>
    %76 = vector.broadcast %75 : vector<8x1xf32> to vector<8x8xf32>
    %77 = arith.divf %73, %76 : vector<8x8xf32>
    %78 = vector.shape_cast %77 : vector<8x8xf32> to vector<8x8x1xf32>
    %79 = arith.extf %14 : vector<8x8x128xbf16> to vector<8x8x128xf32>
    %80 = vector.broadcast %78 : vector<8x8x1xf32> to vector<8x8x128xf32>
    %81 = arith.mulf %80, %79 : vector<8x8x128xf32>
    %cst_32 = arith.constant dense<0.000000e+00> : vector<8x128xf32>
    %82 = vector.multi_reduction <add>, %81, %cst_32 [1] : vector<8x8x128xf32> to vector<8x128xf32>
    %83 = tpu.concatenate %82, %55 in 1 : vector<8x128xf32>, vector<8x128xf32> -> vector<8x256xf32>
    %84 = arith.truncf %83 : vector<8x256xf32> to vector<8x256xbf16>
    %cst_33 = arith.constant dense<0.000000e+00> : vector<8x128xf32>
    %85 = tpu.matmul %84, %20, %cst_33 {dimension_numbers = #tpu.dot_dimension_numbers<[1], [0], [0], [1], [0, 0, 1, 1], [], []>} : vector<8x256xbf16>, vector<256x128xbf16>, vector<8x128xf32> -> vector<8x128xf32>
    %86 = arith.addf %85, %23 : vector<8x128xf32>
    %c2_i32 = arith.constant 2 : i32
    %87 = vector.broadcast %18 : vector<1x128xf32> to vector<8x128xf32>
    %88 = arith.mulf %86, %87 : vector<8x128xf32>
    %cst_34 = arith.constant dense<0.000000e+00> : vector<8xf32>
    %89 = vector.multi_reduction <add>, %88, %cst_34 [1] : vector<8x128xf32> to vector<8xf32>
    %90 = vector.shape_cast %89 : vector<8xf32> to vector<8x1xf32>
    %91 = vector.broadcast %19 : vector<1x1xf32> to vector<8x1xf32>
    %92 = arith.addf %90, %91 : vector<8x1xf32>
    %93 = vector.broadcast %92 : vector<8x1xf32> to vector<8x8xf32>
    %94 = arith.addf %13, %93 : vector<8x8xf32>
    %95 = math.tanh %94 : vector<8x8xf32>
    %cst_35 = arith.constant -1.000000e+30 : f32
    %96 = vector.shape_cast %17 : vector<1x8xi1> to vector<1x8xi1>
    %97 = vector.broadcast %96 : vector<1x8xi1> to vector<8x8xi1>
    %98 = vector.broadcast %cst_35 : f32 to vector<8x8xf32>
    %99 = arith.select %97, %95, %98 : vector<8x8xi1>, vector<8x8xf32>
    %cst_36 = arith.constant dense<0xFF800000> : vector<8xf32>
    %100 = vector.multi_reduction <maximumf>, %99, %cst_36 [1] : vector<8x8xf32> to vector<8xf32>
    %101 = vector.shape_cast %100 : vector<8xf32> to vector<8x1xf32>
    %102 = vector.broadcast %101 : vector<8x1xf32> to vector<8x8xf32>
    %103 = arith.subf %99, %102 : vector<8x8xf32>
    %104 = math.exp %103 : vector<8x8xf32>
    %cst_37 = arith.constant dense<0.000000e+00> : vector<8xf32>
    %105 = vector.multi_reduction <add>, %104, %cst_37 [1] : vector<8x8xf32> to vector<8xf32>
    %106 = vector.shape_cast %105 : vector<8xf32> to vector<8x1xf32>
    %107 = vector.broadcast %106 : vector<8x1xf32> to vector<8x8xf32>
    %108 = arith.divf %104, %107 : vector<8x8xf32>
    %109 = vector.shape_cast %108 : vector<8x8xf32> to vector<8x8x1xf32>
    %110 = arith.extf %14 : vector<8x8x128xbf16> to vector<8x8x128xf32>
    %111 = vector.broadcast %109 : vector<8x8x1xf32> to vector<8x8x128xf32>
    %112 = arith.mulf %111, %110 : vector<8x8x128xf32>
    %cst_38 = arith.constant dense<0.000000e+00> : vector<8x128xf32>
    %113 = vector.multi_reduction <add>, %112, %cst_38 [1] : vector<8x8x128xf32> to vector<8x128xf32>
    %114 = tpu.concatenate %113, %86 in 1 : vector<8x128xf32>, vector<8x128xf32> -> vector<8x256xf32>
    %115 = arith.truncf %114 : vector<8x256xf32> to vector<8x256xbf16>
    %cst_39 = arith.constant dense<0.000000e+00> : vector<8x128xf32>
    %116 = tpu.matmul %115, %20, %cst_39 {dimension_numbers = #tpu.dot_dimension_numbers<[1], [0], [0], [1], [0, 0, 1, 1], [], []>} : vector<8x256xbf16>, vector<256x128xbf16>, vector<8x128xf32> -> vector<8x128xf32>
    %117 = arith.addf %116, %23 : vector<8x128xf32>
    %c3_i32 = arith.constant 3 : i32
    %118 = vector.broadcast %18 : vector<1x128xf32> to vector<8x128xf32>
    %119 = arith.mulf %117, %118 : vector<8x128xf32>
    %cst_40 = arith.constant dense<0.000000e+00> : vector<8xf32>
    %120 = vector.multi_reduction <add>, %119, %cst_40 [1] : vector<8x128xf32> to vector<8xf32>
    %121 = vector.shape_cast %120 : vector<8xf32> to vector<8x1xf32>
    %122 = vector.broadcast %19 : vector<1x1xf32> to vector<8x1xf32>
    %123 = arith.addf %121, %122 : vector<8x1xf32>
    %124 = vector.broadcast %123 : vector<8x1xf32> to vector<8x8xf32>
    %125 = arith.addf %13, %124 : vector<8x8xf32>
    %126 = math.tanh %125 : vector<8x8xf32>
    %cst_41 = arith.constant -1.000000e+30 : f32
    %127 = vector.shape_cast %17 : vector<1x8xi1> to vector<1x8xi1>
    %128 = vector.broadcast %127 : vector<1x8xi1> to vector<8x8xi1>
    %129 = vector.broadcast %cst_41 : f32 to vector<8x8xf32>
    %130 = arith.select %128, %126, %129 : vector<8x8xi1>, vector<8x8xf32>
    %cst_42 = arith.constant dense<0xFF800000> : vector<8xf32>
    %131 = vector.multi_reduction <maximumf>, %130, %cst_42 [1] : vector<8x8xf32> to vector<8xf32>
    %132 = vector.shape_cast %131 : vector<8xf32> to vector<8x1xf32>
    %133 = vector.broadcast %132 : vector<8x1xf32> to vector<8x8xf32>
    %134 = arith.subf %130, %133 : vector<8x8xf32>
    %135 = math.exp %134 : vector<8x8xf32>
    %cst_43 = arith.constant dense<0.000000e+00> : vector<8xf32>
    %136 = vector.multi_reduction <add>, %135, %cst_43 [1] : vector<8x8xf32> to vector<8xf32>
    %137 = vector.shape_cast %136 : vector<8xf32> to vector<8x1xf32>
    %138 = vector.broadcast %137 : vector<8x1xf32> to vector<8x8xf32>
    %139 = arith.divf %135, %138 : vector<8x8xf32>
    %140 = vector.shape_cast %139 : vector<8x8xf32> to vector<8x8x1xf32>
    %141 = arith.extf %14 : vector<8x8x128xbf16> to vector<8x8x128xf32>
    %142 = vector.broadcast %140 : vector<8x8x1xf32> to vector<8x8x128xf32>
    %143 = arith.mulf %142, %141 : vector<8x8x128xf32>
    %cst_44 = arith.constant dense<0.000000e+00> : vector<8x128xf32>
    %144 = vector.multi_reduction <add>, %143, %cst_44 [1] : vector<8x8x128xf32> to vector<8x128xf32>
    %145 = tpu.concatenate %144, %117 in 1 : vector<8x128xf32>, vector<8x128xf32> -> vector<8x256xf32>
    %146 = arith.truncf %145 : vector<8x256xf32> to vector<8x256xbf16>
    %cst_45 = arith.constant dense<0.000000e+00> : vector<8x128xf32>
    %147 = tpu.matmul %146, %20, %cst_45 {dimension_numbers = #tpu.dot_dimension_numbers<[1], [0], [0], [1], [0, 0, 1, 1], [], []>} : vector<8x256xbf16>, vector<256x128xbf16>, vector<8x128xf32> -> vector<8x128xf32>
    %148 = arith.addf %147, %23 : vector<8x128xf32>
    %c4_i32 = arith.constant 4 : i32
    %149 = vector.broadcast %18 : vector<1x128xf32> to vector<8x128xf32>
    %150 = arith.mulf %148, %149 : vector<8x128xf32>
    %cst_46 = arith.constant dense<0.000000e+00> : vector<8xf32>
    %151 = vector.multi_reduction <add>, %150, %cst_46 [1] : vector<8x128xf32> to vector<8xf32>
    %152 = vector.shape_cast %151 : vector<8xf32> to vector<8x1xf32>
    %153 = vector.broadcast %19 : vector<1x1xf32> to vector<8x1xf32>
    %154 = arith.addf %152, %153 : vector<8x1xf32>
    %155 = vector.broadcast %154 : vector<8x1xf32> to vector<8x8xf32>
    %156 = arith.addf %13, %155 : vector<8x8xf32>
    %157 = math.tanh %156 : vector<8x8xf32>
    %cst_47 = arith.constant -1.000000e+30 : f32
    %158 = vector.shape_cast %17 : vector<1x8xi1> to vector<1x8xi1>
    %159 = vector.broadcast %158 : vector<1x8xi1> to vector<8x8xi1>
    %160 = vector.broadcast %cst_47 : f32 to vector<8x8xf32>
    %161 = arith.select %159, %157, %160 : vector<8x8xi1>, vector<8x8xf32>
    %cst_48 = arith.constant dense<0xFF800000> : vector<8xf32>
    %162 = vector.multi_reduction <maximumf>, %161, %cst_48 [1] : vector<8x8xf32> to vector<8xf32>
    %163 = vector.shape_cast %162 : vector<8xf32> to vector<8x1xf32>
    %164 = vector.broadcast %163 : vector<8x1xf32> to vector<8x8xf32>
    %165 = arith.subf %161, %164 : vector<8x8xf32>
    %166 = math.exp %165 : vector<8x8xf32>
    %cst_49 = arith.constant dense<0.000000e+00> : vector<8xf32>
    %167 = vector.multi_reduction <add>, %166, %cst_49 [1] : vector<8x8xf32> to vector<8xf32>
    %168 = vector.shape_cast %167 : vector<8xf32> to vector<8x1xf32>
    %169 = vector.broadcast %168 : vector<8x1xf32> to vector<8x8xf32>
    %170 = arith.divf %166, %169 : vector<8x8xf32>
    %171 = vector.shape_cast %170 : vector<8x8xf32> to vector<8x8x1xf32>
    %172 = arith.extf %14 : vector<8x8x128xbf16> to vector<8x8x128xf32>
    %173 = vector.broadcast %171 : vector<8x8x1xf32> to vector<8x8x128xf32>
    %174 = arith.mulf %173, %172 : vector<8x8x128xf32>
    %cst_50 = arith.constant dense<0.000000e+00> : vector<8x128xf32>
    %175 = vector.multi_reduction <add>, %174, %cst_50 [1] : vector<8x8x128xf32> to vector<8x128xf32>
    %176 = tpu.concatenate %175, %148 in 1 : vector<8x128xf32>, vector<8x128xf32> -> vector<8x256xf32>
    %177 = arith.truncf %176 : vector<8x256xf32> to vector<8x256xbf16>
    %cst_51 = arith.constant dense<0.000000e+00> : vector<8x128xf32>
    %178 = tpu.matmul %177, %20, %cst_51 {dimension_numbers = #tpu.dot_dimension_numbers<[1], [0], [0], [1], [0, 0, 1, 1], [], []>} : vector<8x256xbf16>, vector<256x128xbf16>, vector<8x128xf32> -> vector<8x128xf32>
    %179 = arith.addf %178, %23 : vector<8x128xf32>
    %c5_i32 = arith.constant 5 : i32
    %180 = vector.broadcast %18 : vector<1x128xf32> to vector<8x128xf32>
    %181 = arith.mulf %179, %180 : vector<8x128xf32>
    %cst_52 = arith.constant dense<0.000000e+00> : vector<8xf32>
    %182 = vector.multi_reduction <add>, %181, %cst_52 [1] : vector<8x128xf32> to vector<8xf32>
    %183 = vector.shape_cast %182 : vector<8xf32> to vector<8x1xf32>
    %184 = vector.broadcast %19 : vector<1x1xf32> to vector<8x1xf32>
    %185 = arith.addf %183, %184 : vector<8x1xf32>
    %186 = vector.broadcast %185 : vector<8x1xf32> to vector<8x8xf32>
    %187 = arith.addf %13, %186 : vector<8x8xf32>
    %188 = math.tanh %187 : vector<8x8xf32>
    %cst_53 = arith.constant -1.000000e+30 : f32
    %189 = vector.shape_cast %17 : vector<1x8xi1> to vector<1x8xi1>
    %190 = vector.broadcast %189 : vector<1x8xi1> to vector<8x8xi1>
    %191 = vector.broadcast %cst_53 : f32 to vector<8x8xf32>
    %192 = arith.select %190, %188, %191 : vector<8x8xi1>, vector<8x8xf32>
    %cst_54 = arith.constant dense<0xFF800000> : vector<8xf32>
    %193 = vector.multi_reduction <maximumf>, %192, %cst_54 [1] : vector<8x8xf32> to vector<8xf32>
    %194 = vector.shape_cast %193 : vector<8xf32> to vector<8x1xf32>
    %195 = vector.broadcast %194 : vector<8x1xf32> to vector<8x8xf32>
    %196 = arith.subf %192, %195 : vector<8x8xf32>
    %197 = math.exp %196 : vector<8x8xf32>
    %cst_55 = arith.constant dense<0.000000e+00> : vector<8xf32>
    %198 = vector.multi_reduction <add>, %197, %cst_55 [1] : vector<8x8xf32> to vector<8xf32>
    %199 = vector.shape_cast %198 : vector<8xf32> to vector<8x1xf32>
    %200 = vector.broadcast %199 : vector<8x1xf32> to vector<8x8xf32>
    %201 = arith.divf %197, %200 : vector<8x8xf32>
    %202 = vector.shape_cast %201 : vector<8x8xf32> to vector<8x8x1xf32>
    %203 = arith.extf %14 : vector<8x8x128xbf16> to vector<8x8x128xf32>
    %204 = vector.broadcast %202 : vector<8x8x1xf32> to vector<8x8x128xf32>
    %205 = arith.mulf %204, %203 : vector<8x8x128xf32>
    %cst_56 = arith.constant dense<0.000000e+00> : vector<8x128xf32>
    %206 = vector.multi_reduction <add>, %205, %cst_56 [1] : vector<8x8x128xf32> to vector<8x128xf32>
    %207 = tpu.concatenate %206, %179 in 1 : vector<8x128xf32>, vector<8x128xf32> -> vector<8x256xf32>
    %208 = arith.truncf %207 : vector<8x256xf32> to vector<8x256xbf16>
    %cst_57 = arith.constant dense<0.000000e+00> : vector<8x128xf32>
    %209 = tpu.matmul %208, %20, %cst_57 {dimension_numbers = #tpu.dot_dimension_numbers<[1], [0], [0], [1], [0, 0, 1, 1], [], []>} : vector<8x256xbf16>, vector<256x128xbf16>, vector<8x128xf32> -> vector<8x128xf32>
    %210 = arith.addf %209, %23 : vector<8x128xf32>
    %211 = arith.truncf %210 : vector<8x128xf32> to vector<8x128xbf16>
    %c0_58 = arith.constant 0 : index
    %c0_59 = arith.constant 0 : index
    %212 = vector.load %arg11[%c0_58, %c0_59] : memref<128x128xbf16, #tpu.memory_space<vmem>>, vector<128x128xbf16>
    %cst_60 = arith.constant dense<0.000000e+00> : vector<8x128xf32>
    %213 = tpu.matmul %211, %212, %cst_60 {dimension_numbers = #tpu.dot_dimension_numbers<[1], [0], [0], [1], [0, 0, 1, 1], [], []>} : vector<8x128xbf16>, vector<128x128xbf16>, vector<8x128xf32> -> vector<8x128xf32>
    %c0_61 = arith.constant 0 : index
    %c0_62 = arith.constant 0 : index
    %214 = vector.load %arg12[%c0_61, %c0_62] : memref<1x128xf32, #tpu.memory_space<vmem>>, vector<1x128xf32>
    %215 = vector.broadcast %214 : vector<1x128xf32> to vector<8x128xf32>
    %216 = arith.addf %213, %215 : vector<8x128xf32>
    %c0_63 = arith.constant 0 : index
    %c0_64 = arith.constant 0 : index
    %217 = vector.load %arg13[%c0_63, %c0_64] : memref<8x128xf32, #tpu.memory_space<vmem>>, vector<8x128xf32>
    tpu.vector_store %arg13[%c0_63, %c0_64], %216 {strides = array<i32>} : memref<8x128xf32, #tpu.memory_space<vmem>>, vector<8x128xf32>,
    return
  }
  func.func @transform_0(%arg0: i32) -> (i32, i32, i32) {
    %c0_i32 = arith.constant 0 : i32
    %c0_i32_0 = arith.constant 0 : i32
    %c0_i32_1 = arith.constant 0 : i32
    return %arg0, %c0_i32, %c0_i32_0 : i32, i32, i32
  }
  func.func @transform_1(%arg0: i32) -> (i32, i32) {
    %c0_i32 = arith.constant 0 : i32
    %c0_i32_0 = arith.constant 0 : i32
    return %arg0, %c0_i32 : i32, i32
  }
  func.func @transform_2(%arg0: i32) -> (i32, i32) {
    %c0_i32 = arith.constant 0 : i32
    %c0_i32_0 = arith.constant 0 : i32
    %c0_i32_1 = arith.constant 0 : i32
    return %c0_i32, %c0_i32_0 : i32, i32
  }
  func.func @transform_3(%arg0: i32) -> (i32, i32) {
    %c0_i32 = arith.constant 0 : i32
    %c0_i32_0 = arith.constant 0 : i32
    %c0_i32_1 = arith.constant 0 : i32
    return %c0_i32, %c0_i32_0 : i32, i32
  }
  func.func @transform_4(%arg0: i32) -> (i32, i32) {
    %c0_i32 = arith.constant 0 : i32
    %c0_i32_0 = arith.constant 0 : i32
    %c0_i32_1 = arith.constant 0 : i32
    return %c0_i32, %c0_i32_0 : i32, i32
  }
  func.func @transform_5(%arg0: i32) -> (i32, i32) {
    %c0_i32 = arith.constant 0 : i32
    %c0_i32_0 = arith.constant 0 : i32
    %c0_i32_1 = arith.constant 0 : i32
    return %c0_i32, %c0_i32_0 : i32, i32
  }
  func.func @transform_6(%arg0: i32) -> (i32, i32) {
    %c0_i32 = arith.constant 0 : i32
    %c0_i32_0 = arith.constant 0 : i32
    %c0_i32_1 = arith.constant 0 : i32
    return %c0_i32, %c0_i32_0 : i32, i32
  }
  func.func @transform_7(%arg0: i32) -> (i32, i32) {
    %c0_i32 = arith.constant 0 : i32
    %c0_i32_0 = arith.constant 0 : i32
    %c0_i32_1 = arith.constant 0 : i32
    return %c0_i32, %c0_i32_0 : i32, i32
  }
  func.func @transform_8(%arg0: i32) -> (i32, i32) {
    %c0_i32 = arith.constant 0 : i32
    %c0_i32_0 = arith.constant 0 : i32
    %c0_i32_1 = arith.constant 0 : i32
    return %c0_i32, %c0_i32_0 : i32, i32
  }
  func.func @transform_9(%arg0: i32) -> (i32, i32) {
    %c0_i32 = arith.constant 0 : i32
    %c0_i32_0 = arith.constant 0 : i32
    %c0_i32_1 = arith.constant 0 : i32
    return %c0_i32, %c0_i32_0 : i32, i32
  }
  func.func @transform_10(%arg0: i32) -> (i32, i32) {
    %c0_i32 = arith.constant 0 : i32
    %c0_i32_0 = arith.constant 0 : i32
    %c0_i32_1 = arith.constant 0 : i32
    return %c0_i32, %c0_i32_0 : i32, i32
  }
  func.func @transform_11(%arg0: i32) -> (i32, i32) {
    %c0_i32 = arith.constant 0 : i32
    %c0_i32_0 = arith.constant 0 : i32
    %c0_i32_1 = arith.constant 0 : i32
    return %c0_i32, %c0_i32_0 : i32, i32
  }
  func.func @transform_12(%arg0: i32) -> (i32, i32) {
    %c0_i32 = arith.constant 0 : i32
    %c0_i32_0 = arith.constant 0 : i32
    return %arg0, %c0_i32 : i32, i32
  }
}

</mosaic_0001>

<bundles_post_ra>
// kernel: memnet_forward.1
= control target key start
LH: loop header
LB: loop body
LE: loop exit
PB: predicated region body
PF: predicated region fallthrough
CT: control target
= control target key end

     0   :  { %v2880_v16 = vmov 0   ;;  %v323_v49 = vlaneseq  ;;  %vm451_vm0 = vcmask 1041409   ;;  %vm453_vm2 = vcmask 1042434   ;;  %s3774_s3 = inlined_call_operand.vmem [shape: bf16[128,128], index: 3, kind: input, shape index: {}]   ;;  %s3775_s0 = inlined_call_operand.vmem [shape: bf16[8,8,128], index: 0, kind: input, shape index: {}]   ;;  %s3776_s1 = inlined_call_operand.vmem [shape: f32[8,128], index: 1, kind: input, shape index: {}]   ;;  %s3777_s6 = inlined_call_operand.vmem [shape: f32[1,128], index: 6, kind: input, shape index: {}]   ;;  %s3778_s7 = inlined_call_operand.<no memory space> [shape: f32[1,1], index: 7, kind: input, shape index: {}]   ;;  %s3779_s4 = inlined_call_operand.vmem [shape: f32[1,128], index: 4, kind: input, shape index: {}]   ;;  %s3780_s5 = inlined_call_operand.vmem [shape: f32[1,128], index: 5, kind: input, shape index: {}]   ;;  %s3781_s2 = inlined_call_operand.vmem [shape: f32[1,8], index: 2, kind: input, shape index: {}]   ;;  %s3782_s8 = inlined_call_operand.vmem [shape: bf16[256,128], index: 8, kind: input, shape index: {}]   ;;  %s3783_s9 = inlined_call_operand.vmem [shape: f32[1,128], index: 9, kind: input, shape index: {}]   ;;  %s3784_s10 = inlined_call_operand.vmem [shape: bf16[128,128], index: 10, kind: input, shape index: {}]   ;;  %s3785_s11 = inlined_call_operand.vmem [shape: f32[1,128], index: 11, kind: input, shape index: {}]   ;;  %s3786_s12 = inlined_call_operand.vmem [shape: f32[8,128], index: 12, kind: output, shape index: {}]  }
   0x1   :  { %v2704_v0 = vld [vmem:[%s3774_s3] sm:$0xff]   ;;  %v2705_v1 = vld [vmem:[%s3774_s3 + $0x8] sm:$0xff]   ;;  %v2706_v2 = vld [vmem:[%s3774_s3 + $0x10] sm:$0xff]   ;;  %v17_v15 = vstv %s3778_s7  ;;  %2702 = vset.pattern.permute.xlu0 %v2880_v16  ;;  %2703 = vset.pattern.permute.xlu1 %v2880_v16  ;;  %vm455_vm3 = vcmask 1043459   ;;  %vm457_vm4 = vcmask 1044484   ;;  %vm459_vm5 = vcmask 1045509  }
   0x2   :  { %2655 = vmatprep.subr.bf16.mxu0 %v2704_v0  ;;  %v2707_v3 = vld [vmem:[%s3774_s3 + $0x18] sm:$0xff]   ;;  %v2712_v4 = vld [vmem:[%s3775_s0] sm:$0xff]   ;;  %v2709_v9 = vld [vmem:[%s3774_s3 + $0x28] sm:$0xff]   ;;  %18 = vst [vmem:[#allocation2] sm:$0x1] %v17_v15  ;;  %v324_v52 = vshrl.u32 %v323_v49, 7 }
   0x3   :  { %2656 = vmatpush3.bf16.msra.mxu0 %v2704_v0  ;;  %2671 = vmatprep.mubr.bf16.mxu0 %v2712_v4  ;;  %v2708_v5 = vld [vmem:[%s3774_s3 + $0x20] sm:$0xff]   ;;  %v2710_v10 = vld [vmem:[%s3774_s3 + $0x30] sm:$0xff]   ;;  %v2711_v11 = vld [vmem:[%s3774_s3 + $0x38] sm:$0xff]   ;;  %vm461_vm6 = vcmask 1046534   ;;  %vm463_vm7 = vcmask 1047559   ;;  %vm467_vm9 = vcmask 64512  }
   0x4   :  { %2657 = vmatprep.subr.bf16.mxu0 %v2705_v1  ;;  %v2969_v6 = vld [vmem:[%s3777_s6] ss:$0 sm:$0xff]  ;;  %v2713_v12 = vld [vmem:[%s3775_s0 + $0x8] sm:$0xff]   ;;  %v2714_v13 = vld [vmem:[%s3775_s0 + $0x10] sm:$0xff]   ;;  %v3046_v54 = vsub.s32 0, %v324_v52  ;;  %v3050_v56 = vsub.s32 2, %v324_v52 }
   0x5   :  { %v2974_v7 = vld [vmem:[%s3776_s1] sm:$0xff]  ;;  %v2715_v14 = vld [vmem:[%s3775_s0 + $0x18] sm:$0xff]   ;;  %v3052_v57 = vsub.s32 7, %v324_v52  ;;  %v3054_v59 = vsub.s32 3, %v324_v52  ;;  %v3075_v15 = vsub.s32 6, %v324_v52  ;;  %vm2882_vm10 = vmmov 0  }
   0x6   :  { %v309_v8 = vmul.f32 %v2969_v6, %v2974_v7  ;;  %v2472_v17 = vld [vmem:[%s3779_s4] ss:$0 sm:$0xff] }
   0x7   :  { %2658 = vmatpush3.bf16.msra.mxu0 %v2705_v1  ;;  %v2473_v19 = vld [vmem:[%s3780_s5] ss:$0 sm:$0xff]  ;;  %3826 = vst [vmem:[#allocation5_spill] sm:$0xff] %v3052_v57 }
   0x8   :  { %2659 = vmatprep.subr.bf16.mxu0 %v2706_v2  ;;  %310 = vadd.xlane.f32.xlu0 %v309_v8 }
   0x9   :  { %v3031_v43 = vld [vmem:[#allocation2] ss:$0 sm:$0xff] }
   0xb   :  { %2660 = vmatpush3.bf16.msra.mxu0 %v2706_v2  ;;  %v3063_v2 = vsub.s32 1, %v324_v52 }
   0xc   :  { %2661 = vmatprep.subr.bf16.mxu0 %v2707_v3 }
   0xf   :  { %2662 = vmatpush3.bf16.msra.mxu0 %v2707_v3 }
  0x10   :  { %2663 = vmatprep.subr.bf16.mxu0 %v2708_v5 }
  0x13   :  { %2664 = vmatpush3.bf16.msra.mxu0 %v2708_v5  ;;  %v3067_v5 = vsub.s32 4, %v324_v52 }
  0x14   :  { %2665 = vmatprep.subr.bf16.mxu0 %v2709_v9 }
  0x17   :  { %2666 = vmatpush3.bf16.msra.mxu0 %v2709_v9 }
  0x18   :  { %2667 = vmatprep.subr.bf16.mxu0 %v2710_v10 }
  0x1b   :  { %2668 = vmatpush3.bf16.msra.mxu0 %v2710_v10  ;;  %v3071_v10 = vsub.s32 5, %v324_v52 }
  0x1c   :  { %2669 = vmatprep.subr.bf16.mxu0 %v2711_v11 }
  0x1f   :  { %2670 = vmatpush3.bf16.msra.mxu0 %v2711_v11 }
  0x22   :  { %2672 = vmatmul.mubr.bf16.vlgmr.msra.gmra.mrb[0].mxu0 %v2713_v12 }
  0x23   :  { %2675 = vmatprep.mubr.bf16.mxu0 %v2714_v13 }
  0x2a   :  { %2676 = vmatmul.mubr.bf16.gmra.mrb[4].mxu0 %v2715_v14 }
  0x95   :  { %v311_v44 = vpop.xlane.xlu0 %310 }
  0x96   :  { %v318_v45 = vadd.f32 %v3031_v43, %v311_v44 }
  0xf5   :  { %v2673_v18 = vpop.f32.mrb[0].mxu0 }
  0xf6   :  { %v3007_v20 = vadd.f32 %v2673_v18, %v2472_v17  ;;  %v174_v21 = vpop.f32.mrb[1].mxu0 }
  0xf7   :  { %v3009_v22 = vadd.f32 %v2472_v17, %v174_v21  ;;  %v2674_v23 = vpop.f32.mrb[2].mxu0 }
  0xf8   :  { %v177_v24 = vpop.f32.mrb[3].mxu0  ;;  %v229_v25 = vmul.f32 %v2473_v19, %v3007_v20  ;;  %v3012_v26 = vadd.f32 %v2674_v23, %v2472_v17 }
  0xf9   :  { %v3014_v27 = vadd.f32 %v2472_v17, %v177_v24  ;;  %v227_v28 = vmul.f32 %v2473_v19, %v3009_v22 }
  0xfa   :  { %239 = vadd.xlane.f32.xlu1 %v229_v25  ;;  %v230_v31 = vmul.f32 %v2473_v19, %v3012_v26 }
  0xfb   :  { %235 = vadd.xlane.f32.xlu0 %v227_v28  ;;  %v228_v29 = vmul.f32 %v2473_v19, %v3014_v27 }
  0xfd   :  { %v2677_v30 = vpop.f32.mrb[4].mxu0 }
  0xfe   :  { %v3019_v32 = vadd.f32 %v2677_v30, %v2472_v17  ;;  %237 = vadd.xlane.f32.xlu1 %v228_v29  ;;  %v190_v33 = vpop.f32.mrb[5].mxu0 }
  0xff   :  { %241 = vadd.xlane.f32.xlu0 %v230_v31  ;;  %v2678_v34 = vpop.f32.mrb[6].mxu0  ;;  %v3021_v35 = vadd.f32 %v2472_v17, %v190_v33 }
 0x100   :  { %v193_v36 = vpop.f32.mrb[7].mxu0  ;;  %v233_v37 = vmul.f32 %v2473_v19, %v3019_v32  ;;  %v3027_v40 = vadd.f32 %v2678_v34, %v2472_v17 }
 0x101   :  { %v3024_v38 = vadd.f32 %v2472_v17, %v193_v36  ;;  %v231_v41 = vmul.f32 %v2473_v19, %v3021_v35  ;;  %v418_v36 = vand.u32 127, %v323_v49 }
 0x102   :  { %247 = vadd.xlane.f32.xlu1 %v233_v37  ;;  %v234_v42 = vmul.f32 %v2473_v19, %v3027_v40 }
 0x103   :  { %v232_v39 = vmul.f32 %v2473_v19, %v3024_v38 }
 0x105   :  { %245 = vadd.xlane.f32.xlu0 %v232_v39  ;;  %v3082_v39 = vsub.s32 %v418_v36, %v324_v52  ;;  %v3129_v36 = vld [vmem:[%s3782_s8 + $0x48] sm:$0xff]  }
 0x106   :  { %243 = vadd.xlane.f32.xlu1 %v231_v41 }
 0x107   :  { %3828 = vst [vmem:[#allocation7_spill] sm:$0xff] %v3082_v39 }
 0x10a   :  { %249 = vadd.xlane.f32.xlu1 %v234_v42  ;;  %v259_v42 = vld [vmem:[%s3781_s2] sm:$0x1] }
 0x10b   :  { %vm260_vm1 = vcmp.gt.f32.partialorder %v259_v42, 0.5 }
 0x10c   :  { %v379_v52 = vsel %vm260_vm1, 1, %v2880_v16 }
 0x11b   :  { %321 = vperm.xlu0 %2702, %v318_v45  }
 0x187   :  { %v3034_v46 = vpop.xlane.xlu1 %239 }
 0x188   :  { %v3038_v48 = vpop.xlane.xlu0 %235 }
 0x18b   :  { %v3036_v47 = vpop.xlane.xlu1 %237 }
 0x18c   :  { %v3042_v51 = vpop.xlane.xlu0 %241 }
 0x18f   :  { %v3040_v50 = vpop.xlane.xlu1 %247 }
 0x190   :  { %3824 = vst [vmem:[#allocation3_spill] sm:$0xff] %v3040_v50 }
 0x192   :  { %v3044_v53 = vpop.xlane.xlu0 %245 }
 0x193   :  { %3825 = vst [vmem:[#allocation4_spill] sm:$0xff] %v3044_v53  ;;  %v3048_v55 = vpop.xlane.xlu1 %243 }
 0x197   :  { %v3059_v63 = vpop.xlane.xlu1 %249 }
 0x198   :  { %3827 = vst [vmem:[#allocation6_spill] sm:$0xff] %v3059_v63 }
 0x19a   :  { %v322_v58 = vpop.permute.xlu0 %321 }
 0x19b   :  { %v326_v60 = vrot.slane %v322_v58, %v3046_v54  ;;  %v334_v61 = vrot.slane %v322_v58, %v3050_v56  ;;  %v354_v62 = vrot.slane %v322_v58, %v3052_v57  ;;  %v338_v3 = vrot.slane %v322_v58, %v3054_v59 }
 0x19c   :  { %v330_v8 = vrot.slane %v322_v58, %v3063_v2  ;;  %v342_v11 = vrot.slane %v322_v58, %v3067_v5  ;;  %v346_v17 = vrot.slane %v322_v58, %v3071_v10  ;;  %v350_v21 = vrot.slane %v322_v58, %v3075_v15 }
 0x19d   :  { %v365_v0 = vadd.f32 %v334_v61, %v3034_v46  ;;  %v370_v1 = vadd.f32 %v354_v62, %v3059_v63  ;;  %v363_v4 = vadd.f32 %v326_v60, %v3038_v48  ;;  %v366_v9 = vadd.f32 %v338_v3, %v3042_v51 }
 0x19e   :  { %v364_v12 = vadd.f32 %v330_v8, %v3036_v47  ;;  %v367_v18 = vadd.f32 %v342_v11, %v3048_v55  ;;  %v368_v23 = vadd.f32 %v346_v17, %v3044_v53  ;;  %v369_v25 = vadd.f32 %v350_v21, %v3040_v50 }
 0x19f   :  { %2740 = vtanh.f32 %v365_v0  ;;  %v383_v3 = vrot.slane %v379_v52, %v3046_v54 }
 0x1a0   :  { %2742 = vtanh.f32 %v370_v1 }
 0x1a1   :  { %2744 = vtanh.f32 %v363_v4  ;;  %vm3100_vm8 = vcmp.eq.s32.totalorder %v383_v3, 1  ;;  %v3176_v3 = vld [vmem:[%s3782_s8 + $0x60] sm:$0xff]  }
 0x1a2   :  { %2746 = vtanh.f32 %v366_v9 }
 0x1a3   :  { %2748 = vtanh.f32 %v364_v12 }
 0x1a4   :  { %2750 = vtanh.f32 %v367_v18 }
 0x1a5   :  { %2752 = vtanh.f32 %v368_v23 }
 0x1a6   :  { %2754 = vtanh.f32 %v369_v25 }
 0x1a9   :  { %v2741_v13 = vpop.eup %2740 }
 0x1aa   :  { %v2743_v14 = vpop.eup %2742  ;;  %400 = vperm.xlu1 %2703, %v2741_v13   ;;  %v3829_v13 = vmov 0 }
 0x1ab   :  { %415 = vperm.xlu0 %2702, %v2743_v14   ;;  %v2745_v19 = vpop.eup %2744  ;;  %v3830_v13 = vsel %vm3100_vm8, 4294967295, %v3829_v13 }
 0x1ac   :  { %v2747_v24 = vpop.eup %2746  ;;  %3831 = vst [vmem:[#allocation8_spill] sm:$0xff] %v3830_v13 }
 0x1ad   :  { %v2749_v28 = vpop.eup %2748 }
 0x1ae   :  { %394 = vperm.xlu1 %2703, %v2745_v19   ;;  %v2751_v29 = vpop.eup %2750 }
 0x1af   :  { %v2753_v30 = vpop.eup %2752 }
 0x1b0   :  { %v2755_v31 = vpop.eup %2754 }
 0x1b2   :  { %403 = vperm.xlu1 %2703, %v2747_v24  }
 0x1b6   :  { %397 = vperm.xlu1 %2703, %v2749_v28  }
 0x1ba   :  { %406 = vperm.xlu1 %2703, %v2751_v29  }
 0x1be   :  { %409 = vperm.xlu1 %2703, %v2753_v30  }
 0x1c2   :  { %412 = vperm.xlu1 %2703, %v2755_v31   ;;  %v3115_v31 = vld [vmem:[%s3782_s8 + $0x40] sm:$0xff]  }
 0x1c3   :  { %2514 = vmatprep.subr.bf16.mxu1 %v3115_v31  ;;  %2536 = vmatprep.subr.bf16.mxu0 %v3115_v31 }
 0x229   :  { %v401_v33 = vpop.permute.xlu1 %400 }
 0x22a   :  { %v430_v49 = vrot.slane %v401_v33, %v3082_v39  ;;  %v416_v9 = vpop.permute.xlu0 %415  ;;  %v3120_v33 = vld [vmem:[%s3782_s8] sm:$0xff]  }
 0x22b   :  { %v450_v14 = vrot.slane %v416_v9, %v3082_v39  ;;  %2515 = vmatpush3.bf16.msra.mxu1 %v3120_v33  ;;  %2537 = vmatpush3.bf16.msra.mxu0 %v3120_v33 }
 0x22c   :  { %2516 = vmatprep.subr.bf16.mxu1 %v3129_v36  ;;  %2538 = vmatprep.subr.bf16.mxu0 %v3129_v36 }
 0x22d   :  { %v395_v34 = vpop.permute.xlu1 %394 }
 0x22e   :  { %v422_v45 = vrot.slane %v395_v34, %v3082_v39 }
 0x231   :  { %v404_v37 = vpop.permute.xlu1 %403 }
 0x232   :  { %v434_v62 = vrot.slane %v404_v37, %v3082_v39 }
 0x235   :  { %v398_v41 = vpop.permute.xlu1 %397 }
 0x236   :  { %v426_v44 = vrot.slane %v398_v41, %v3082_v39  ;;  %v3134_v41 = vld [vmem:[%s3782_s8 + $0x8] sm:$0xff]  }
 0x237   :  { %2517 = vmatpush3.bf16.msra.mxu1 %v3134_v41  ;;  %2539 = vmatpush3.bf16.msra.mxu0 %v3134_v41 }
 0x238   :  { %v452_v58 = vsel %vm451_vm0, %v426_v44, %v422_v45 }
 0x239   :  { %v407_v60 = vpop.permute.xlu1 %406  ;;  %v454_v61 = vsel %vm453_vm2, %v430_v49, %v452_v58  ;;  %v3145_v58 = vld [vmem:[%s3782_s8 + $0x50] sm:$0xff]  }
 0x23a   :  { %v438_v1 = vrot.slane %v407_v60, %v3082_v39  ;;  %v456_v4 = vsel %vm455_vm3, %v434_v62, %v454_v61  ;;  %v3150_v60 = vld [vmem:[%s3782_s8 + $0x10] sm:$0xff]   ;;  %2518 = vmatprep.subr.bf16.mxu1 %v3145_v58  ;;  %2540 = vmatprep.subr.bf16.mxu0 %v3145_v58  ;;  %v3160_v61 = vld [vmem:[%s3782_s8 + $0x58] sm:$0xff]  }
 0x23b   :  { %2519 = vmatpush3.bf16.msra.mxu1 %v3150_v60  ;;  %2541 = vmatpush3.bf16.msra.mxu0 %v3150_v60  ;;  %v3166_v62 = vld [vmem:[%s3782_s8 + $0x18] sm:$0xff]  }
 0x23c   :  { %v458_v16 = vsel %vm457_vm4, %v438_v1, %v456_v4  ;;  %2520 = vmatprep.subr.bf16.mxu1 %v3160_v61  ;;  %2542 = vmatprep.subr.bf16.mxu0 %v3160_v61  ;;  %v3182_v4 = vld [vmem:[%s3782_s8 + $0x20] sm:$0xff]  }
 0x23d   :  { %v410_v0 = vpop.permute.xlu1 %409 }
 0x23e   :  { %v442_v8 = vrot.slane %v410_v0, %v3082_v39 }
 0x23f   :  { %2521 = vmatpush3.bf16.msra.mxu1 %v3166_v62  ;;  %2543 = vmatpush3.bf16.msra.mxu0 %v3166_v62 }
 0x240   :  { %v460_v17 = vsel %vm459_vm5, %v442_v8, %v458_v16  ;;  %2522 = vmatprep.subr.bf16.mxu1 %v3176_v3  ;;  %2544 = vmatprep.subr.bf16.mxu0 %v3176_v3  ;;  %v3198_v16 = vld [vmem:[%s3782_s8 + $0x28] sm:$0xff]  }
 0x241   :  { %v413_v11 = vpop.permute.xlu1 %412 }
 0x242   :  { %v446_v12 = vrot.slane %v413_v11, %v3082_v39  ;;  %v3192_v11 = vld [vmem:[%s3782_s8 + $0x68] sm:$0xff]  }
 0x243   :  { %2523 = vmatpush3.bf16.msra.mxu1 %v3182_v4  ;;  %2545 = vmatpush3.bf16.msra.mxu0 %v3182_v4 }
 0x244   :  { %v462_v18 = vsel %vm461_vm6, %v446_v12, %v460_v17  ;;  %2524 = vmatprep.subr.bf16.mxu1 %v3192_v11  ;;  %v3204_v12 = vld [vmem:[%s3782_s8 + $0x70] sm:$0xff]   ;;  %2546 = vmatprep.subr.bf16.mxu0 %v3192_v11 }
 0x245   :  { %v464_v19 = vsel %vm463_vm7, %v450_v14, %v462_v18  ;;  %v616_v14 = vpack.c.bf16 %v2974_v7, %v2974_v7  ;;  %v3213_v17 = vld [vmem:[%s3782_s8 + $0x30] sm:$0xff]   ;;  %v3220_v18 = vld [vmem:[%s3782_s8 + $0x78] sm:$0xff]  }
 0x246   :  { %v466_v21 = vsel %vm3100_vm8, %v464_v19, -1e+30  ;;  %v3227_v7 = vld [vmem:[%s3782_s8 + $0x38] sm:$0xff]   ;;  %v251_v19 = vpack.c.bf16 %v3009_v22, %v3009_v22 }
 0x247   :  { %v468_v23 = vsel %vm467_vm9, %v466_v21, -inf  ;;  %2525 = vmatpush3.bf16.msra.mxu1 %v3198_v16  ;;  %2547 = vmatpush3.bf16.msra.mxu0 %v3198_v16 }
 0x248   :  { %469 = vmax.xlane.f32.xlu1 %v468_v23  ;;  %2526 = vmatprep.subr.bf16.mxu1 %v3204_v12  ;;  %v253_v23 = vpack.c.bf16 %v3007_v20, %v3007_v20  ;;  %v255_v20 = vpack.c.bf16 %v3021_v35, %v3021_v35  ;;  %v258_v35 = vpack.c.bf16 %v3027_v40, %v3027_v40 }
 0x249   :  { %745 = vmatprep.mubr.bf16.mxu1 %v616_v14  ;;  %2548 = vmatprep.subr.bf16.mxu0 %v3204_v12 }
 0x24a   :  { %v3250_v22 = vunpack.c.l.bf16 %v253_v23  ;;  %v257_v23 = vpack.c.bf16 %v3019_v32, %v3019_v32 }
 0x24b   :  { %2527 = vmatpush3.bf16.msra.mxu1 %v3213_v17  ;;  %2549 = vmatpush3.bf16.msra.mxu0 %v3213_v17 }
 0x24c   :  { %2528 = vmatprep.subr.bf16.mxu1 %v3220_v18  ;;  %2550 = vmatprep.subr.bf16.mxu0 %v3220_v18  ;;  %3834 = vst [vmem:[#allocation11_spill] sm:$0xff] %v3250_v22 }
 0x24f   :  { %2529 = vmatpush3.bf16.msra.mxu1 %v3227_v7  ;;  %2551 = vmatpush3.bf16.msra.mxu0 %v3227_v7 }
 0x250   :  { %2558 = vmatprep.subr.bf16.mxu1 %v3115_v31  ;;  %2580 = vmatprep.subr.bf16.mxu0 %v3115_v31 }
 0x2d5   :  { %v470_v24 = vpop.xlane.xlu1 %469 }
 0x2d6   :  { %v471_v25 = vsub.f32 %v466_v21, %v470_v24  ;;  %v252_v21 = vpack.c.bf16 %v3014_v27, %v3014_v27  ;;  %v3242_v24 = vunpack.c.l.bf16 %v251_v19 }
 0x2d8   :  { %v472_v28 = vmul.f32 1.442695, %v471_v25  ;;  %3832 = vst [vmem:[#allocation9_spill] sm:$0xff] %v3242_v24  ;;  %v254_v25 = vpack.c.bf16 %v3012_v26, %v3012_v26  ;;  %v256_v26 = vpack.c.bf16 %v3024_v38, %v3024_v38 }
 0x2da   :  { %2756 = vpow2.f32 %v472_v28  ;;  %v3246_v28 = vunpack.c.l.bf16 %v252_v21  ;;  %v3266_v38 = vunpack.c.l.bf16 %v256_v26 }
 0x2dc   :  { %3833 = vst [vmem:[#allocation10_spill] sm:$0xff] %v3246_v28  ;;  %3837 = vst [vmem:[#allocation14_spill] sm:$0xff] %v3266_v38 }
 0x2e4   :  { %v2757_v29 = vpop.eup %2756 }
 0x2e5   :  { %v474_v30 = vsel %vm467_vm9, %v2757_v29, 0.0 }
 0x2e6   :  { %475 = vadd.xlane.f32.xlu0 %v474_v30 }
 0x373   :  { %v476_v34 = vpop.xlane.xlu0 %475 }
 0x374   :  { %2758 = vrcp.f32 %v476_v34 }
 0x37e   :  { %v2759_v37 = vpop.eup %2758 }
 0x37f   :  { %v478_v42 = vmul.f32 %v2759_v37, %v2757_v29 }
 0x381   :  { %v489_v44 = vrot.slane %v478_v42, %v3063_v2  ;;  %v482_v45 = vrot.slane %v478_v42, %v3046_v54  ;;  %v496_v49 = vrot.slane %v478_v42, %v3050_v56  ;;  %v503_v52 = vrot.slane %v478_v42, %v3054_v59 }
 0x382   :  { %v510_v0 = vrot.slane %v478_v42, %v3067_v5  ;;  %v517_v1 = vrot.slane %v478_v42, %v3071_v10  ;;  %v524_v8 = vrot.slane %v478_v42, %v3075_v15  ;;  %v531_v9 = vrot.slane %v478_v42, %v3052_v57 }
 0x383   :  { %491 = vbcast.lane.b32.xlu1 %v489_v44, 256  ;;  %484 = vbcast.lane.b32.xlu0 %v482_v45, 256  ;;  %v3252_v42 = vunpack.c.l.bf16 %v254_v25  ;;  %v3262_v25 = vunpack.c.l.bf16 %v255_v20 }
 0x385   :  { %3835 = vst [vmem:[#allocation12_spill] sm:$0xff] %v3252_v42  ;;  %3836 = vst [vmem:[#allocation13_spill] sm:$0xff] %v3262_v25 }
 0x387   :  { %498 = vbcast.lane.b32.xlu1 %v496_v49, 256  ;;  %505 = vbcast.lane.b32.xlu0 %v503_v52, 256 }
 0x38b   :  { %512 = vbcast.lane.b32.xlu1 %v510_v0, 256  ;;  %519 = vbcast.lane.b32.xlu0 %v517_v1, 256 }
 0x38f   :  { %526 = vbcast.lane.b32.xlu1 %v524_v8, 256  ;;  %533 = vbcast.lane.b32.xlu0 %v531_v9, 256 }
 0x3f5   :  { %v492_v29 = vpop.permute.xlu1 %491  ;;  %v485_v30 = vpop.permute.xlu0 %484 }
 0x3f6   :  { %v544_v34 = vmul.f32 %v3246_v28, %v492_v29  ;;  %v543_v37 = vmul.f32 %v3242_v24, %v485_v30  ;;  %v3270_v28 = vunpack.c.l.bf16 %v257_v23  ;;  %v3272_v24 = vunpack.c.l.bf16 %v258_v35 }
 0x3f8   :  { %v557_v27 = vrot.slane %v544_v34, 4  ;;  %v551_v44 = vrot.slane %v543_v37, 4  ;;  %3838 = vst [vmem:[#allocation15_spill] sm:$0xff] %v3270_v28  ;;  %3839 = vst [vmem:[#allocation16_spill] sm:$0xff] %v3272_v24 }
 0x3f9   :  { %v499_v45 = vpop.permute.xlu1 %498  ;;  %v506_v49 = vpop.permute.xlu0 %505 }
 0x3fa   :  { %v558_v52 = vadd.f32 %v557_v27, %v544_v34  ;;  %v552_v0 = vadd.f32 %v551_v44, %v543_v37  ;;  %v545_v1 = vmul.f32 %v3250_v22, %v499_v45  ;;  %v546_v8 = vmul.f32 %v3252_v42, %v506_v49 }
 0x3fc   :  { %v559_v9 = vrot.slane %v558_v52, 2  ;;  %v553_v14 = vrot.slane %v552_v0, 2  ;;  %v563_v19 = vrot.slane %v545_v1, 4  ;;  %v569_v21 = vrot.slane %v546_v8, 4 }
 0x3fd   :  { %v513_v29 = vpop.permute.xlu1 %512  ;;  %v520_v30 = vpop.permute.xlu0 %519 }
 0x3fe   :  { %v560_v34 = vadd.f32 %v559_v9, %v558_v52  ;;  %v554_v37 = vadd.f32 %v553_v14, %v552_v0  ;;  %v564_v27 = vadd.f32 %v563_v19, %v545_v1  ;;  %v570_v44 = vadd.f32 %v569_v21, %v546_v8 }
 0x3ff   :  { %v547_v45 = vmul.f32 %v3262_v25, %v513_v29  ;;  %v548_v49 = vmul.f32 %v3266_v38, %v520_v30 }
 0x400   :  { %v561_v42 = vrot.slane %v560_v34, 1  ;;  %v555_v22 = vrot.slane %v554_v37, 1  ;;  %v565_v32 = vrot.slane %v564_v27, 2  ;;  %v571_v20 = vrot.slane %v570_v44, 2 }
 0x401   :  { %v575_v40 = vrot.slane %v547_v45, 4  ;;  %v581_v26 = vrot.slane %v548_v49, 4  ;;  %v527_v13 = vpop.permute.xlu1 %526  ;;  %v534_v39 = vpop.permute.xlu0 %533 }
 0x402   :  { %v566_v52 = vadd.f32 %v565_v32, %v564_v27  ;;  %v572_v0 = vadd.f32 %v571_v20, %v570_v44  ;;  %v549_v9 = vmul.f32 %v3270_v28, %v527_v13  ;;  %v550_v14 = vmul.f32 %v3272_v24, %v534_v39 }
 0x403   :  { %v576_v1 = vadd.f32 %v575_v40, %v547_v45  ;;  %v582_v8 = vadd.f32 %v581_v26, %v548_v49  ;;  %v562_v19 = vadd.f32 %v561_v42, %v560_v34  ;;  %v556_v21 = vadd.f32 %v555_v22, %v554_v37 }
 0x404   :  { %v567_v29 = vrot.slane %v566_v52, 1  ;;  %v573_v30 = vrot.slane %v572_v0, 1  ;;  %v587_v35 = vrot.slane %v549_v9, 4  ;;  %v593_v38 = vrot.slane %v550_v14, 4 }
 0x405   :  { %v577_v23 = vrot.slane %v576_v1, 2  ;;  %v583_v25 = vrot.slane %v582_v8, 2  ;;  %v607_v44 = vsel %vm451_vm0, %v562_v19, %v556_v21 }
 0x406   :  { %v568_v63 = vadd.f32 %v567_v29, %v566_v52  ;;  %v588_v53 = vadd.f32 %v587_v35, %v549_v9  ;;  %v594_v27 = vadd.f32 %v593_v38, %v550_v14  ;;  %v574_v45 = vadd.f32 %v573_v30, %v572_v0 }
 0x407   :  { %v578_v50 = vadd.f32 %v577_v23, %v576_v1  ;;  %v584_v57 = vadd.f32 %v583_v25, %v582_v8 }
 0x408   :  { %v608_v13 = vsel %vm453_vm2, %v568_v63, %v607_v44  ;;  %v589_v42 = vrot.slane %v588_v53, 2  ;;  %v595_v22 = vrot.slane %v594_v27, 2 }
 0x409   :  { %v579_v49 = vrot.slane %v578_v50, 1  ;;  %v585_v39 = vrot.slane %v584_v57, 1  ;;  %v609_v32 = vsel %vm455_vm3, %v574_v45, %v608_v13 }
 0x40a   :  { %v590_v37 = vadd.f32 %v589_v42, %v588_v53  ;;  %v596_v40 = vadd.f32 %v595_v22, %v594_v27  ;;  %v3302_v53 = vld [vmem:[%s3783_s9] ss:$0 sm:$0xff] }
 0x40b   :  { %v580_v34 = vadd.f32 %v579_v49, %v578_v50  ;;  %v586_v20 = vadd.f32 %v585_v39, %v584_v57 }
 0x40c   :  { %v591_v26 = vrot.slane %v590_v37, 1  ;;  %v597_v52 = vrot.slane %v596_v40, 1 }
 0x40d   :  { %v610_v25 = vsel %vm457_vm4, %v580_v34, %v609_v32 }
 0x40e   :  { %v592_v38 = vadd.f32 %v591_v26, %v590_v37  ;;  %v598_v1 = vadd.f32 %v597_v52, %v596_v40  ;;  %v611_v0 = vsel %vm459_vm5, %v586_v20, %v610_v25  ;;  %v3840_v25 = vld [vmem:[#allocation4_spill] sm:$0xff] }
 0x410   :  { %v612_v63 = vsel %vm461_vm6, %v592_v38, %v611_v0 }
 0x411   :  { %v613_v8 = vsel %vm463_vm7, %v598_v1, %v612_v63  ;;  %v3841_v1 = vld [vmem:[#allocation5_spill] sm:$0xff]  ;;  %v3842_v63 = vld [vmem:[#allocation3_spill] sm:$0xff] }
 0x412   :  { %v615_v9 = vpack.c.bf16 %v613_v8, %v613_v8 }
 0x414   :  { %746 = vmatmul.mubr.bf16.vlgmr.msra.gmra.mrb[0].mxu1 %v615_v9 }
 0x415   :  { %2559 = vmatpush3.bf16.msra.mxu1 %v3120_v33 }
 0x416   :  { %2560 = vmatprep.subr.bf16.mxu1 %v3129_v36 }
 0x419   :  { %2561 = vmatpush3.bf16.msra.mxu1 %v3134_v41 }
 0x41a   :  { %2562 = vmatprep.subr.bf16.mxu1 %v3145_v58 }
 0x41d   :  { %2563 = vmatpush3.bf16.msra.mxu1 %v3150_v60 }
 0x41e   :  { %2564 = vmatprep.subr.bf16.mxu1 %v3160_v61 }
 0x421   :  { %2565 = vmatpush3.bf16.msra.mxu1 %v3166_v62 }
 0x422   :  { %2566 = vmatprep.subr.bf16.mxu1 %v3176_v3 }
 0x425   :  { %2567 = vmatpush3.bf16.msra.mxu1 %v3182_v4 }
 0x426   :  { %2568 = vmatprep.subr.bf16.mxu1 %v3192_v11 }
 0x429   :  { %2569 = vmatpush3.bf16.msra.mxu1 %v3198_v16 }
 0x42a   :  { %2570 = vmatprep.subr.bf16.mxu1 %v3204_v12 }
 0x42d   :  { %2571 = vmatpush3.bf16.msra.mxu1 %v3213_v17 }
 0x42e   :  { %2572 = vmatprep.subr.bf16.mxu1 %v3220_v18 }
 0x431   :  { %2573 = vmatpush3.bf16.msra.mxu1 %v3227_v7 }
 0x432   :  { %2602 = vmatprep.subr.bf16.mxu1 %v3115_v31 }
 0x4e7   :  { %v2530_v50 = vpop.f32.mrb[0].mxu1 }
 0x4e8   :  { %v2531_v57 = vpop.f32.mrb[1].mxu1 }
 0x4e9   :  { %v2532_v14 = vadd.f32 %v2531_v57, %v2530_v50  ;;  %v2533_v19 = vpop.f32.mrb[2].mxu1  ;;  %v3843_v50 = vld [vmem:[#allocation6_spill] sm:$0xff] }
 0x4ea   :  { %v2534_v21 = vpop.f32.mrb[3].mxu1 }
 0x4eb   :  { %v748_v29 = vadd.f32 %v2532_v14, %v3302_v53 }
 0x4ed   :  { %v1030_v30 = vpack.c.bf16 %v748_v29, %v748_v29  ;;  %v753_v23 = vmul.f32 %v2969_v6, %v748_v29 }
 0x4ef   :  { %1063 = vmatprep.mubr.bf16.mxu0 %v1030_v30  ;;  %754 = vadd.xlane.f32.xlu1 %v753_v23 }
 0x57c   :  { %v755_v35 = vpop.xlane.xlu1 %754 }
 0x57d   :  { %v756_v27 = vadd.f32 %v3031_v43, %v755_v35 }
 0x57f   :  { %759 = vperm.xlu0 %2702, %v756_v27  }
 0x5fe   :  { %v760_v44 = vpop.permute.xlu0 %759 }
 0x5ff   :  { %v764_v45 = vrot.slane %v760_v44, %v3046_v54  ;;  %v768_v13 = vrot.slane %v760_v44, %v3063_v2  ;;  %v772_v39 = vrot.slane %v760_v44, %v3050_v56  ;;  %v776_v6 = vrot.slane %v760_v44, %v3054_v59 }
 0x600   :  { %v780_v43 = vrot.slane %v760_v44, %v3067_v5  ;;  %v784_v32 = vrot.slane %v760_v44, %v3071_v10  ;;  %v788_v26 = vrot.slane %v760_v44, %v3075_v15  ;;  %v792_v0 = vrot.slane %v760_v44, %v3841_v1 }
 0x601   :  { %v801_v49 = vadd.f32 %v764_v45, %v3038_v48  ;;  %v802_v42 = vadd.f32 %v768_v13, %v3036_v47  ;;  %v803_v22 = vadd.f32 %v772_v39, %v3034_v46  ;;  %v804_v34 = vadd.f32 %v776_v6, %v3042_v51  ;;  %v3844_v13 = vld [vmem:[#allocation7_spill] sm:$0xff] }
 0x602   :  { %v805_v20 = vadd.f32 %v780_v43, %v3048_v55  ;;  %v806_v52 = vadd.f32 %v784_v32, %v3840_v25  ;;  %v807_v8 = vadd.f32 %v788_v26, %v3842_v63  ;;  %v808_v57 = vadd.f32 %v792_v0, %v3843_v50 }
 0x603   :  { %2760 = vtanh.f32 %v801_v49 }
 0x604   :  { %2762 = vtanh.f32 %v802_v42 }
 0x605   :  { %2764 = vtanh.f32 %v803_v22 }
 0x606   :  { %2766 = vtanh.f32 %v804_v34 }
 0x607   :  { %2768 = vtanh.f32 %v805_v20 }
 0x608   :  { %2770 = vtanh.f32 %v806_v52 }
 0x609   :  { %2772 = vtanh.f32 %v807_v8 }
 0x60a   :  { %2774 = vtanh.f32 %v808_v57 }
 0x60d   :  { %v2761_v37 = vpop.eup %2760 }
 0x60e   :  { %826 = vperm.xlu0 %2702, %v2761_v37   ;;  %v2763_v40 = vpop.eup %2762 }
 0x60f   :  { %v2765_v38 = vpop.eup %2764 }
 0x610   :  { %v2767_v9 = vpop.eup %2766 }
 0x611   :  { %v2769_v14 = vpop.eup %2768 }
 0x612   :  { %829 = vperm.xlu0 %2702, %v2763_v40   ;;  %v2771_v19 = vpop.eup %2770 }
 0x613   :  { %v2773_v21 = vpop.eup %2772 }
 0x614   :  { %v2775_v29 = vpop.eup %2774 }
 0x616   :  { %832 = vperm.xlu0 %2702, %v2765_v38  }
 0x61a   :  { %835 = vperm.xlu0 %2702, %v2767_v9  }
 0x61e   :  { %838 = vperm.xlu0 %2702, %v2769_v14  }
 0x622   :  { %841 = vperm.xlu0 %2702, %v2771_v19  }
 0x626   :  { %844 = vperm.xlu0 %2702, %v2773_v21  }
 0x62a   :  { %847 = vperm.xlu0 %2702, %v2775_v29  }
 0x68d   :  { %v827_v30 = vpop.permute.xlu0 %826 }
 0x68e   :  { %v852_v42 = vrot.slane %v827_v30, %v3844_v13 }
 0x691   :  { %v830_v23 = vpop.permute.xlu0 %829 }
 0x692   :  { %v856_v49 = vrot.slane %v830_v23, %v3844_v13 }
 0x694   :  { %v881_v34 = vsel %vm451_vm0, %v856_v49, %v852_v42 }
 0x695   :  { %v833_v35 = vpop.permute.xlu0 %832 }
 0x696   :  { %v860_v39 = vrot.slane %v833_v35, %v3844_v13 }
 0x698   :  { %v882_v32 = vsel %vm453_vm2, %v860_v39, %v881_v34 }
 0x699   :  { %v836_v27 = vpop.permute.xlu0 %835 }
 0x69a   :  { %v864_v6 = vrot.slane %v836_v27, %v3844_v13 }
 0x69c   :  { %v883_v40 = vsel %vm455_vm3, %v864_v6, %v882_v32 }
 0x69d   :  { %v839_v44 = vpop.permute.xlu0 %838 }
 0x69e   :  { %v868_v22 = vrot.slane %v839_v44, %v3844_v13 }
 0x6a0   :  { %v884_v26 = vsel %vm457_vm4, %v868_v22, %v883_v40 }
 0x6a1   :  { %v842_v45 = vpop.permute.xlu0 %841 }
 0x6a2   :  { %v872_v37 = vrot.slane %v842_v45, %v3844_v13 }
 0x6a4   :  { %v885_v38 = vsel %vm459_vm5, %v872_v37, %v884_v26 }
 0x6a5   :  { %v845_v43 = vpop.permute.xlu0 %844 }
 0x6a6   :  { %v876_v20 = vrot.slane %v845_v43, %v3844_v13 }
 0x6a8   :  { %v886_v8 = vsel %vm461_vm6, %v876_v20, %v885_v38  ;;  %v3846_v20 = vld [vmem:[#allocation9_spill] sm:$0xff] }
 0x6a9   :  { %v848_v52 = vpop.permute.xlu0 %847 }
 0x6aa   :  { %v880_v0 = vrot.slane %v848_v52, %v3844_v13  ;;  %v3847_v52 = vld [vmem:[#allocation10_spill] sm:$0xff] }
 0x6ac   :  { %v887_v9 = vsel %vm463_vm7, %v880_v0, %v886_v8 }
 0x6ad   :  { %v889_v14 = vsel %vm3100_vm8, %v887_v9, -1e+30 }
 0x6ae   :  { %v890_v19 = vsel %vm467_vm9, %v889_v14, -inf }
 0x6af   :  { %891 = vmax.xlane.f32.xlu1 %v890_v19  ;;  %v3848_v19 = vld [vmem:[#allocation11_spill] sm:$0xff] }
 0x73c   :  { %v892_v21 = vpop.xlane.xlu1 %891 }
 0x73d   :  { %v893_v29 = vsub.f32 %v889_v14, %v892_v21 }
 0x73f   :  { %v894_v30 = vmul.f32 1.442695, %v893_v29  ;;  %v3849_v29 = vld [vmem:[#allocation14_spill] sm:$0xff] }
 0x741   :  { %2776 = vpow2.f32 %v894_v30 }
 0x74b   :  { %v2777_v23 = vpop.eup %2776 }
 0x74c   :  { %v896_v35 = vsel %vm467_vm9, %v2777_v23, 0.0 }
 0x74d   :  { %897 = vadd.xlane.f32.xlu0 %v896_v35 }
 0x7da   :  { %v898_v27 = vpop.xlane.xlu0 %897 }
 0x7db   :  { %2778 = vrcp.f32 %v898_v27 }
 0x7e5   :  { %v2779_v44 = vpop.eup %2778 }
 0x7e6   :  { %v900_v45 = vmul.f32 %v2779_v44, %v2777_v23 }
 0x7e8   :  { %v939_v49 = vrot.slane %v900_v45, %v3071_v10  ;;  %v904_v39 = vrot.slane %v900_v45, %v3046_v54  ;;  %v911_v42 = vrot.slane %v900_v45, %v3063_v2  ;;  %v918_v6 = vrot.slane %v900_v45, %v3050_v56 }
 0x7e9   :  { %v925_v22 = vrot.slane %v900_v45, %v3054_v59  ;;  %v932_v43 = vrot.slane %v900_v45, %v3067_v5  ;;  %v946_v34 = vrot.slane %v900_v45, %v3075_v15  ;;  %v953_v37 = vrot.slane %v900_v45, %v3841_v1 }
 0x7ea   :  { %941 = vbcast.lane.b32.xlu0 %v939_v49, 256  ;;  %906 = vbcast.lane.b32.xlu1 %v904_v39, 256  ;;  %v3850_v39 = vld [vmem:[#allocation12_spill] sm:$0xff] }
 0x7ee   :  { %913 = vbcast.lane.b32.xlu1 %v911_v42, 256 }
 0x7f2   :  { %920 = vbcast.lane.b32.xlu1 %v918_v6, 256 }
 0x7f6   :  { %927 = vbcast.lane.b32.xlu1 %v925_v22, 256 }
 0x7fa   :  { %934 = vbcast.lane.b32.xlu1 %v932_v43, 256 }
 0x7fe   :  { %948 = vbcast.lane.b32.xlu1 %v946_v34, 256 }
 0x802   :  { %955 = vbcast.lane.b32.xlu1 %v953_v37, 256 }
 0x85c   :  { %v907_v32 = vpop.permute.xlu1 %906  ;;  %v942_v0 = vpop.permute.xlu0 %941 }
 0x85d   :  { %v957_v40 = vmul.f32 %v907_v32, %v3846_v20  ;;  %v962_v30 = vmul.f32 %v942_v0, %v3849_v29  ;;  %v3851_v32 = vld [vmem:[#allocation13_spill] sm:$0xff] }
 0x85f   :  { %v965_v9 = vrot.slane %v957_v40, 4  ;;  %v995_v49 = vrot.slane %v962_v30, 4 }
 0x860   :  { %v914_v26 = vpop.permute.xlu1 %913 }
 0x861   :  { %v958_v38 = vmul.f32 %v914_v26, %v3847_v52  ;;  %v966_v27 = vadd.f32 %v965_v9, %v957_v40  ;;  %v996_v20 = vadd.f32 %v995_v49, %v962_v30 }
 0x863   :  { %v971_v8 = vrot.slane %v958_v38, 4  ;;  %v967_v22 = vrot.slane %v966_v27, 2 }
 0x864   :  { %v921_v14 = vpop.permute.xlu1 %920 }
 0x865   :  { %v959_v21 = vmul.f32 %v921_v14, %v3848_v19  ;;  %v972_v23 = vadd.f32 %v971_v8, %v958_v38  ;;  %v968_v0 = vadd.f32 %v967_v22, %v966_v27 }
 0x867   :  { %v977_v35 = vrot.slane %v959_v21, 4  ;;  %v973_v6 = vrot.slane %v972_v23, 2  ;;  %v969_v13 = vrot.slane %v968_v0, 1 }
 0x868   :  { %v928_v44 = vpop.permute.xlu1 %927 }
 0x869   :  { %v978_v45 = vadd.f32 %v977_v35, %v959_v21  ;;  %v960_v42 = vmul.f32 %v928_v44, %v3850_v39  ;;  %v974_v14 = vadd.f32 %v973_v6, %v972_v23  ;;  %v997_v35 = vrot.slane %v996_v20, 2 }
 0x86b   :  { %v979_v43 = vrot.slane %v978_v45, 2  ;;  %v983_v34 = vrot.slane %v960_v42, 4  ;;  %v975_v39 = vrot.slane %v974_v14, 1  ;;  %v998_v27 = vadd.f32 %v997_v35, %v996_v20 }
 0x86c   :  { %v935_v37 = vpop.permute.xlu1 %934 }
 0x86d   :  { %v961_v26 = vmul.f32 %v935_v37, %v3851_v32  ;;  %v984_v52 = vadd.f32 %v983_v34, %v960_v42  ;;  %v980_v38 = vadd.f32 %v979_v43, %v978_v45  ;;  %v976_v45 = vadd.f32 %v975_v39, %v974_v14 }
 0x86e   :  { %v970_v43 = vadd.f32 %v969_v13, %v968_v0 }
 0x86f   :  { %v989_v19 = vrot.slane %v961_v26, 4  ;;  %v985_v8 = vrot.slane %v984_v52, 2  ;;  %v981_v50 = vrot.slane %v980_v38, 1 }
 0x870   :  { %v949_v40 = vpop.permute.xlu1 %948 }
 0x871   :  { %v990_v9 = vadd.f32 %v989_v19, %v961_v26  ;;  %v963_v21 = vmul.f32 %v949_v40, %v3270_v28  ;;  %v986_v44 = vadd.f32 %v985_v8, %v984_v52  ;;  %v982_v22 = vadd.f32 %v981_v50, %v980_v38 }
 0x872   :  { %v999_v40 = vrot.slane %v998_v27, 1  ;;  %v1021_v28 = vsel %vm451_vm0, %v976_v45, %v970_v43 }
 0x873   :  { %v991_v29 = vrot.slane %v990_v9, 2  ;;  %v1001_v57 = vrot.slane %v963_v21, 4  ;;  %v987_v37 = vrot.slane %v986_v44, 1 }
 0x874   :  { %v956_v25 = vpop.permute.xlu1 %955  ;;  %v1000_v14 = vadd.f32 %v999_v40, %v998_v27 }
 0x875   :  { %v992_v30 = vadd.f32 %v991_v29, %v990_v9  ;;  %v1002_v49 = vadd.f32 %v1001_v57, %v963_v21  ;;  %v964_v23 = vmul.f32 %v956_v25, %v3272_v24  ;;  %v988_v34 = vadd.f32 %v987_v37, %v986_v44 }
 0x876   :  { %v1022_v57 = vsel %vm453_vm2, %v982_v22, %v1021_v28 }
 0x877   :  { %v993_v42 = vrot.slane %v992_v30, 1  ;;  %v1003_v6 = vrot.slane %v1002_v49, 2  ;;  %v1007_v19 = vrot.slane %v964_v23, 4  ;;  %v1023_v25 = vsel %vm455_vm3, %v988_v34, %v1022_v57  ;;  %v3852_v34 = vld [vmem:[#allocation5_spill] sm:$0xff]  ;;  %v3854_v57 = vld [vmem:[#allocation6_spill] sm:$0xff] }
 0x879   :  { %v1004_v52 = vadd.f32 %v1003_v6, %v1002_v49  ;;  %v1008_v26 = vadd.f32 %v1007_v19, %v964_v23  ;;  %v994_v8 = vadd.f32 %v993_v42, %v992_v30 }
 0x87b   :  { %v1005_v32 = vrot.slane %v1004_v52, 1  ;;  %v1009_v1 = vrot.slane %v1008_v26, 2  ;;  %v1024_v29 = vsel %vm457_vm4, %v994_v8, %v1023_v25 }
 0x87c   :  { %v1025_v13 = vsel %vm459_vm5, %v1000_v14, %v1024_v29 }
 0x87d   :  { %v1010_v20 = vadd.f32 %v1009_v1, %v1008_v26  ;;  %v1006_v39 = vadd.f32 %v1005_v32, %v1004_v52  ;;  %v3853_v26 = vld [vmem:[#allocation4_spill] sm:$0xff] }
 0x87f   :  { %v1011_v50 = vrot.slane %v1010_v20, 1  ;;  %v1026_v38 = vsel %vm461_vm6, %v1006_v39, %v1025_v13 }
 0x881   :  { %v1012_v0 = vadd.f32 %v1011_v50, %v1010_v20 }
 0x883   :  { %v1027_v9 = vsel %vm463_vm7, %v1012_v0, %v1026_v38 }
 0x884   :  { %v1029_v21 = vpack.c.bf16 %v1027_v9, %v1027_v9  ;;  %v3855_v9 = vld [vmem:[#allocation7_spill] sm:$0xff] }
 0x886   :  { %1064 = vmatmul.mubr.bf16.vlgmr.msra.gmra.mrb[8].mxu0 %v1029_v21 }
 0x887   :  { %2581 = vmatpush3.bf16.msra.mxu0 %v3120_v33 }
 0x888   :  { %2582 = vmatprep.subr.bf16.mxu0 %v3129_v36 }
 0x88b   :  { %2583 = vmatpush3.bf16.msra.mxu0 %v3134_v41 }
 0x88c   :  { %2584 = vmatprep.subr.bf16.mxu0 %v3145_v58 }
 0x88f   :  { %2585 = vmatpush3.bf16.msra.mxu0 %v3150_v60 }
 0x890   :  { %2586 = vmatprep.subr.bf16.mxu0 %v3160_v61 }
 0x893   :  { %2587 = vmatpush3.bf16.msra.mxu0 %v3166_v62 }
 0x894   :  { %2588 = vmatprep.subr.bf16.mxu0 %v3176_v3  ;;  %v3385_v3 = vld [vmem:[%s3777_s6] ss:$0 sm:$0xff] }
 0x897   :  { %2589 = vmatpush3.bf16.msra.mxu0 %v3182_v4 }
 0x898   :  { %2590 = vmatprep.subr.bf16.mxu0 %v3192_v11 }
 0x89b   :  { %2591 = vmatpush3.bf16.msra.mxu0 %v3198_v16  ;;  %v3388_v16 = vld [vmem:[#allocation2] ss:$0 sm:$0xff] }
 0x89c   :  { %2592 = vmatprep.subr.bf16.mxu0 %v3204_v12 }
 0x89f   :  { %2593 = vmatpush3.bf16.msra.mxu0 %v3213_v17 }
 0x8a0   :  { %2594 = vmatprep.subr.bf16.mxu0 %v3220_v18 }
 0x8a3   :  { %2595 = vmatpush3.bf16.msra.mxu0 %v3227_v7 }
 0x8a4   :  { %2624 = vmatprep.subr.bf16.mxu0 %v3115_v31 }
 0x959   :  { %v2552_v33 = vpop.f32.mrb[8].mxu0 }
 0x95a   :  { %v2553_v36 = vpop.f32.mrb[9].mxu0 }
 0x95b   :  { %v2554_v41 = vadd.f32 %v2553_v36, %v2552_v33  ;;  %v2555_v58 = vpop.f32.mrb[10].mxu0 }
 0x95c   :  { %v2556_v60 = vpop.f32.mrb[11].mxu0 }
 0x95d   :  { %v1066_v61 = vadd.f32 %v2554_v41, %v3302_v53 }
 0x95f   :  { %v1348_v62 = vpack.c.bf16 %v1066_v61, %v1066_v61  ;;  %v1071_v4 = vmul.f32 %v3385_v3, %v1066_v61 }
 0x961   :  { %1381 = vmatprep.mubr.bf16.mxu1 %v1348_v62  ;;  %1072 = vadd.xlane.f32.xlu1 %v1071_v4 }
 0x9ee   :  { %v1073_v11 = vpop.xlane.xlu1 %1072 }
 0x9ef   :  { %v1074_v31 = vadd.f32 %v3388_v16, %v1073_v11 }
 0x9f1   :  { %1077 = vperm.xlu0 %2702, %v1074_v31  }
 0xa70   :  { %v1078_v12 = vpop.permute.xlu0 %1077 }
 0xa71   :  { %v1082_v28 = vrot.slane %v1078_v12, %v3046_v54  ;;  %v1086_v1 = vrot.slane %v1078_v12, %v3063_v2  ;;  %v1106_v32 = vrot.slane %v1078_v12, %v3075_v15  ;;  %v1090_v44 = vrot.slane %v1078_v12, %v3050_v56 }
 0xa72   :  { %v1094_v49 = vrot.slane %v1078_v12, %v3054_v59  ;;  %v1098_v27 = vrot.slane %v1078_v12, %v3067_v5  ;;  %v1102_v6 = vrot.slane %v1078_v12, %v3071_v10  ;;  %v1110_v52 = vrot.slane %v1078_v12, %v3852_v34 }
 0xa73   :  { %v1119_v35 = vadd.f32 %v1082_v28, %v3038_v48  ;;  %v1120_v37 = vadd.f32 %v1086_v1, %v3036_v47  ;;  %v1125_v30 = vadd.f32 %v1106_v32, %v3842_v63  ;;  %v1121_v23 = vadd.f32 %v1090_v44, %v3034_v46 }
 0xa74   :  { %v1122_v45 = vadd.f32 %v1094_v49, %v3042_v51  ;;  %v1123_v19 = vadd.f32 %v1098_v27, %v3048_v55  ;;  %v1124_v8 = vadd.f32 %v1102_v6, %v3853_v26  ;;  %v1126_v25 = vadd.f32 %v1110_v52, %v3854_v57 }
 0xa75   :  { %2780 = vtanh.f32 %v1119_v35 }
 0xa76   :  { %2782 = vtanh.f32 %v1120_v37 }
 0xa77   :  { %2784 = vtanh.f32 %v1125_v30 }
 0xa78   :  { %2786 = vtanh.f32 %v1121_v23 }
 0xa79   :  { %2788 = vtanh.f32 %v1122_v45 }
 0xa7a   :  { %2790 = vtanh.f32 %v1123_v19 }
 0xa7b   :  { %2792 = vtanh.f32 %v1124_v8 }
 0xa7c   :  { %2794 = vtanh.f32 %v1126_v25 }
 0xa7f   :  { %v2781_v42 = vpop.eup %2780 }
 0xa80   :  { %1144 = vperm.xlu0 %2702, %v2781_v42   ;;  %v2783_v22 = vpop.eup %2782 }
 0xa81   :  { %v2785_v43 = vpop.eup %2784 }
 0xa82   :  { %1162 = vperm.xlu1 %2703, %v2785_v43   ;;  %v2787_v40 = vpop.eup %2786 }
 0xa83   :  { %v2789_v20 = vpop.eup %2788 }
 0xa84   :  { %1147 = vperm.xlu0 %2702, %v2783_v22   ;;  %v2791_v29 = vpop.eup %2790 }
 0xa85   :  { %v2793_v39 = vpop.eup %2792 }
 0xa86   :  { %v2795_v14 = vpop.eup %2794 }
 0xa88   :  { %1150 = vperm.xlu0 %2702, %v2787_v40  }
 0xa8c   :  { %1153 = vperm.xlu0 %2702, %v2789_v20  }
 0xa90   :  { %1156 = vperm.xlu0 %2702, %v2791_v29  }
 0xa94   :  { %1159 = vperm.xlu0 %2702, %v2793_v39  }
 0xa98   :  { %1165 = vperm.xlu0 %2702, %v2795_v14  }
 0xaff   :  { %v1145_v50 = vpop.permute.xlu0 %1144 }
 0xb00   :  { %v1170_v41 = vrot.slane %v1145_v50, %v3855_v9 }
 0xb01   :  { %v1163_v11 = vpop.permute.xlu1 %1162 }
 0xb02   :  { %v1194_v32 = vrot.slane %v1163_v11, %v3855_v9 }
 0xb03   :  { %v1148_v13 = vpop.permute.xlu0 %1147 }
 0xb04   :  { %v1174_v21 = vrot.slane %v1148_v13, %v3855_v9 }
 0xb06   :  { %v1199_v61 = vsel %vm451_vm0, %v1174_v21, %v1170_v41  ;;  %v3857_v21 = vld [vmem:[#allocation10_spill] sm:$0xff] }
 0xb07   :  { %v1151_v0 = vpop.permute.xlu0 %1150 }
 0xb08   :  { %v1178_v33 = vrot.slane %v1151_v0, %v3855_v9 }
 0xb0a   :  { %v1200_v62 = vsel %vm453_vm2, %v1178_v33, %v1199_v61 }
 0xb0b   :  { %v1154_v38 = vpop.permute.xlu0 %1153 }
 0xb0c   :  { %v1182_v58 = vrot.slane %v1154_v38, %v3855_v9 }
 0xb0e   :  { %v1201_v31 = vsel %vm455_vm3, %v1182_v58, %v1200_v62 }
 0xb0f   :  { %v1157_v36 = vpop.permute.xlu0 %1156 }
 0xb10   :  { %v1186_v60 = vrot.slane %v1157_v36, %v3855_v9  ;;  %v3858_v36 = vld [vmem:[#allocation9_spill] sm:$0xff] }
 0xb12   :  { %v1202_v28 = vsel %vm457_vm4, %v1186_v60, %v1201_v31  ;;  %v3859_v31 = vld [vmem:[#allocation14_spill] sm:$0xff] }
 0xb13   :  { %v1160_v4 = vpop.permute.xlu0 %1159 }
 0xb14   :  { %v1190_v12 = vrot.slane %v1160_v4, %v3855_v9 }
 0xb16   :  { %v1203_v1 = vsel %vm459_vm5, %v1190_v12, %v1202_v28  ;;  %v3860_v28 = vld [vmem:[#allocation11_spill] sm:$0xff] }
 0xb17   :  { %v1166_v35 = vpop.permute.xlu0 %1165  ;;  %v1204_v37 = vsel %vm461_vm6, %v1194_v32, %v1203_v1 }
 0xb18   :  { %v1198_v44 = vrot.slane %v1166_v35, %v3855_v9 }
 0xb1a   :  { %v1205_v30 = vsel %vm463_vm7, %v1198_v44, %v1204_v37 }
 0xb1b   :  { %v1207_v23 = vsel %vm3100_vm8, %v1205_v30, -1e+30 }
 0xb1c   :  { %v1208_v27 = vsel %vm467_vm9, %v1207_v23, -inf }
 0xb1d   :  { %1209 = vmax.xlane.f32.xlu0 %v1208_v27 }
 0xbaa   :  { %v1210_v45 = vpop.xlane.xlu0 %1209 }
 0xbab   :  { %v1211_v42 = vsub.f32 %v1207_v23, %v1210_v45 }
 0xbad   :  { %v1212_v6 = vmul.f32 1.442695, %v1211_v42  ;;  %v3861_v42 = vld [vmem:[#allocation12_spill] sm:$0xff] }
 0xbaf   :  { %2796 = vpow2.f32 %v1212_v6 }
 0xbb9   :  { %v2797_v19 = vpop.eup %2796 }
 0xbba   :  { %v1214_v22 = vsel %vm467_vm9, %v2797_v19, 0.0 }
 0xbbb   :  { %1215 = vadd.xlane.f32.xlu1 %v1214_v22 }
 0xc48   :  { %v1216_v43 = vpop.xlane.xlu1 %1215 }
 0xc49   :  { %2798 = vrcp.f32 %v1216_v43 }
 0xc53   :  { %v2799_v52 = vpop.eup %2798 }
 0xc54   :  { %v1218_v8 = vmul.f32 %v2799_v52, %v2797_v19 }
 0xc56   :  { %v1229_v40 = vrot.slane %v1218_v8, %v3063_v2  ;;  %v1222_v25 = vrot.slane %v1218_v8, %v3046_v54  ;;  %v1257_v20 = vrot.slane %v1218_v8, %v3071_v10  ;;  %v1236_v29 = vrot.slane %v1218_v8, %v3050_v56 }
 0xc57   :  { %v1271_v39 = vrot.slane %v1218_v8, %v3852_v34  ;;  %v1243_v14 = vrot.slane %v1218_v8, %v3054_v59  ;;  %v1250_v50 = vrot.slane %v1218_v8, %v3067_v5  ;;  %v1264_v13 = vrot.slane %v1218_v8, %v3075_v15 }
 0xc58   :  { %1231 = vbcast.lane.b32.xlu1 %v1229_v40, 256  ;;  %1224 = vbcast.lane.b32.xlu0 %v1222_v25, 256 }
 0xc5c   :  { %1259 = vbcast.lane.b32.xlu1 %v1257_v20, 256  ;;  %1238 = vbcast.lane.b32.xlu0 %v1236_v29, 256 }
 0xc60   :  { %1273 = vbcast.lane.b32.xlu1 %v1271_v39, 256  ;;  %1245 = vbcast.lane.b32.xlu0 %v1243_v14, 256  ;;  %v3862_v14 = vld [vmem:[#allocation13_spill] sm:$0xff] }
 0xc64   :  { %1252 = vbcast.lane.b32.xlu0 %v1250_v50, 256 }
 0xc68   :  { %1266 = vbcast.lane.b32.xlu0 %v1264_v13, 256 }
 0xcca   :  { %v1232_v0 = vpop.permute.xlu1 %1231  ;;  %v1225_v38 = vpop.permute.xlu0 %1224 }
 0xccb   :  { %v1276_v33 = vmul.f32 %v1232_v0, %v3857_v21  ;;  %v1275_v41 = vmul.f32 %v1225_v38, %v3858_v36 }
 0xccd   :  { %v1289_v58 = vrot.slane %v1276_v33, 4  ;;  %v1283_v60 = vrot.slane %v1275_v41, 4 }
 0xcce   :  { %v1260_v61 = vpop.permute.xlu1 %1259  ;;  %v1239_v62 = vpop.permute.xlu0 %1238 }
 0xccf   :  { %v1290_v4 = vadd.f32 %v1289_v58, %v1276_v33  ;;  %v1284_v11 = vadd.f32 %v1283_v60, %v1275_v41  ;;  %v1280_v12 = vmul.f32 %v1260_v61, %v3859_v31  ;;  %v1277_v1 = vmul.f32 %v1239_v62, %v3860_v28  ;;  %v3863_v60 = vld [vmem:[#allocation15_spill] sm:$0xff] }
 0xcd1   :  { %v1295_v32 = vrot.slane %v1277_v1, 4  ;;  %v1313_v35 = vrot.slane %v1280_v12, 4  ;;  %v1291_v30 = vrot.slane %v1290_v4, 2  ;;  %v1285_v23 = vrot.slane %v1284_v11, 2 }
 0xcd2   :  { %v1274_v44 = vpop.permute.xlu1 %1273  ;;  %v1246_v37 = vpop.permute.xlu0 %1245 }
 0xcd3   :  { %v1296_v27 = vadd.f32 %v1295_v32, %v1277_v1  ;;  %v1282_v45 = vmul.f32 %v1274_v44, %v3272_v24  ;;  %v1278_v6 = vmul.f32 %v1246_v37, %v3861_v42  ;;  %v1314_v22 = vadd.f32 %v1313_v35, %v1280_v12 }
 0xcd4   :  { %v1292_v40 = vadd.f32 %v1291_v30, %v1290_v4  ;;  %v1286_v25 = vadd.f32 %v1285_v23, %v1284_v11 }
 0xcd5   :  { %v1297_v19 = vrot.slane %v1296_v27, 2  ;;  %v1325_v43 = vrot.slane %v1282_v45, 4  ;;  %v1301_v52 = vrot.slane %v1278_v6, 4  ;;  %v1315_v13 = vrot.slane %v1314_v22, 2 }
 0xcd6   :  { %v1253_v8 = vpop.permute.xlu0 %1252  ;;  %v1293_v41 = vrot.slane %v1292_v40, 1  ;;  %v1287_v58 = vrot.slane %v1286_v25, 1 }
 0xcd7   :  { %v1298_v20 = vadd.f32 %v1297_v19, %v1296_v27  ;;  %v1326_v29 = vadd.f32 %v1325_v43, %v1282_v45  ;;  %v1302_v39 = vadd.f32 %v1301_v52, %v1278_v6  ;;  %v1279_v50 = vmul.f32 %v1253_v8, %v3862_v14 }
 0xcd8   :  { %v1316_v4 = vadd.f32 %v1315_v13, %v1314_v22  ;;  %v1294_v37 = vadd.f32 %v1293_v41, %v1292_v40  ;;  %v1288_v30 = vadd.f32 %v1287_v58, %v1286_v25 }
 0xcd9   :  { %v1303_v0 = vrot.slane %v1302_v39, 2  ;;  %v1307_v38 = vrot.slane %v1279_v50, 4  ;;  %v1299_v62 = vrot.slane %v1298_v20, 1  ;;  %v1327_v12 = vrot.slane %v1326_v29, 2 }
 0xcda   :  { %v1267_v33 = vpop.permute.xlu0 %1266  ;;  %v1317_v52 = vrot.slane %v1316_v4, 1 }
 0xcdb   :  { %v1281_v61 = vmul.f32 %v1267_v33, %v3863_v60  ;;  %v1304_v1 = vadd.f32 %v1303_v0, %v1302_v39  ;;  %v1308_v32 = vadd.f32 %v1307_v38, %v1279_v50  ;;  %v1300_v27 = vadd.f32 %v1299_v62, %v1298_v20  ;;  %v3452_v62 = vld [vmem:[%s3782_s8] sm:$0xff]  }
 0xcdc   :  { %v1328_v45 = vadd.f32 %v1327_v12, %v1326_v29  ;;  %v1339_v33 = vsel %vm451_vm0, %v1294_v37, %v1288_v30  ;;  %v1318_v40 = vadd.f32 %v1317_v52, %v1316_v4  ;;  %v3464_v12 = vld [vmem:[%s3782_s8 + $0x8] sm:$0xff]   ;;  %v3488_v4 = vld [vmem:[%s3782_s8 + $0x18] sm:$0xff]  }
 0xcdd   :  { %v1319_v35 = vrot.slane %v1281_v61, 4  ;;  %v1305_v11 = vrot.slane %v1304_v1, 1  ;;  %v1309_v44 = vrot.slane %v1308_v32, 2  ;;  %v1340_v39 = vsel %vm453_vm2, %v1300_v27, %v1339_v33  ;;  %v3506_v37 = vld [vmem:[%s3782_s8 + $0x68] sm:$0xff]  }
 0xcde   :  { %v1329_v50 = vrot.slane %v1328_v45, 1  ;;  %v3512_v30 = vld [vmem:[%s3782_s8 + $0x28] sm:$0xff]  }
 0xcdf   :  { %v1320_v23 = vadd.f32 %v1319_v35, %v1281_v61  ;;  %v1310_v6 = vadd.f32 %v1309_v44, %v1308_v32  ;;  %v1306_v19 = vadd.f32 %v1305_v11, %v1304_v1  ;;  %v3470_v1 = vld [vmem:[%s3782_s8 + $0x50] sm:$0xff]   ;;  %v3482_v35 = vld [vmem:[%s3782_s8 + $0x58] sm:$0xff]   ;;  %v3494_v11 = vld [vmem:[%s3782_s8 + $0x60] sm:$0xff]  }
 0xce0   :  { %v1330_v29 = vadd.f32 %v1329_v50, %v1328_v45  ;;  %v3476_v32 = vld [vmem:[%s3782_s8 + $0x10] sm:$0xff]   ;;  %v3500_v44 = vld [vmem:[%s3782_s8 + $0x20] sm:$0xff]  }
 0xce1   :  { %v1321_v43 = vrot.slane %v1320_v23, 2  ;;  %v1311_v8 = vrot.slane %v1310_v6, 1  ;;  %v1341_v22 = vsel %vm455_vm3, %v1306_v19, %v1340_v39 }
 0xce3   :  { %v1322_v60 = vadd.f32 %v1321_v43, %v1320_v23  ;;  %v1312_v0 = vadd.f32 %v1311_v8, %v1310_v6  ;;  %v3518_v23 = vld [vmem:[%s3782_s8 + $0x70] sm:$0xff]  }
 0xce5   :  { %v1323_v13 = vrot.slane %v1322_v60, 1  ;;  %v1342_v25 = vsel %vm457_vm4, %v1312_v0, %v1341_v22 }
 0xce6   :  { %v1343_v38 = vsel %vm459_vm5, %v1318_v40, %v1342_v25 }
 0xce7   :  { %v1324_v20 = vadd.f32 %v1323_v13, %v1322_v60  ;;  %v3458_v60 = vld [vmem:[%s3782_s8 + $0x48] sm:$0xff]  }
 0xce9   :  { %v1344_v41 = vsel %vm461_vm6, %v1324_v20, %v1343_v38 }
 0xcea   :  { %v1345_v58 = vsel %vm463_vm7, %v1330_v29, %v1344_v41 }
 0xceb   :  { %v1347_v61 = vpack.c.bf16 %v1345_v58, %v1345_v58 }
 0xced   :  { %1382 = vmatmul.mubr.bf16.vlgmr.msra.gmra.mrb[4].mxu1 %v1347_v61 }
 0xcee   :  { %2603 = vmatpush3.bf16.msra.mxu1 %v3452_v62 }
 0xcef   :  { %2604 = vmatprep.subr.bf16.mxu1 %v3458_v60 }
 0xcf2   :  { %2605 = vmatpush3.bf16.msra.mxu1 %v3464_v12 }
 0xcf3   :  { %2606 = vmatprep.subr.bf16.mxu1 %v3470_v1 }
 0xcf6   :  { %2607 = vmatpush3.bf16.msra.mxu1 %v3476_v32 }
 0xcf7   :  { %2608 = vmatprep.subr.bf16.mxu1 %v3482_v35 }
 0xcfa   :  { %2609 = vmatpush3.bf16.msra.mxu1 %v3488_v4 }
 0xcfb   :  { %2610 = vmatprep.subr.bf16.mxu1 %v3494_v11 }
 0xcfe   :  { %2611 = vmatpush3.bf16.msra.mxu1 %v3500_v44 }
 0xcff   :  { %2612 = vmatprep.subr.bf16.mxu1 %v3506_v37 }
 0xd02   :  { %2613 = vmatpush3.bf16.msra.mxu1 %v3512_v30 }
 0xd03   :  { %2614 = vmatprep.subr.bf16.mxu1 %v3518_v23 }
 0xd06   :  { %2615 = vmatpush3.bf16.msra.mxu1 %v3213_v17 }
 0xd07   :  { %2616 = vmatprep.subr.bf16.mxu1 %v3220_v18 }
 0xd0a   :  { %2617 = vmatpush3.bf16.msra.mxu1 %v3227_v7 }
 0xdc0   :  { %v2574_v27 = vpop.f32.mrb[4].mxu1 }
 0xdc1   :  { %v2575_v45 = vpop.f32.mrb[5].mxu1 }
 0xdc2   :  { %v2576_v6 = vadd.f32 %v2575_v45, %v2574_v27  ;;  %v2577_v19 = vpop.f32.mrb[6].mxu1 }
 0xdc3   :  { %v2578_v43 = vpop.f32.mrb[7].mxu1 }
 0xdc4   :  { %v1384_v52 = vadd.f32 %v2576_v6, %v3302_v53 }
 0xdc6   :  { %v1666_v8 = vpack.c.bf16 %v1384_v52, %v1384_v52  ;;  %v1389_v33 = vmul.f32 %v3385_v3, %v1384_v52 }
 0xdc8   :  { %1699 = vmatprep.mubr.bf16.mxu0 %v1666_v8  ;;  %1390 = vadd.xlane.f32.xlu0 %v1389_v33 }
 0xe55   :  { %v1391_v39 = vpop.xlane.xlu0 %1390 }
 0xe56   :  { %v1392_v50 = vadd.f32 %v3388_v16, %v1391_v39 }
 0xe58   :  { %1395 = vperm.xlu1 %2703, %v1392_v50  }
 0xed7   :  { %v1396_v17 = vpop.permute.xlu1 %1395 }
 0xed8   :  { %v1400_v18 = vrot.slane %v1396_v17, %v3046_v54  ;;  %v1404_v7 = vrot.slane %v1396_v17, %v3063_v2  ;;  %v1428_v22 = vrot.slane %v1396_v17, %v3852_v34  ;;  %v1408_v53 = vrot.slane %v1396_v17, %v3050_v56 }
 0xed9   :  { %v1412_v25 = vrot.slane %v1396_v17, %v3054_v59  ;;  %v1416_v29 = vrot.slane %v1396_v17, %v3067_v5  ;;  %v1420_v58 = vrot.slane %v1396_v17, %v3071_v10  ;;  %v1424_v45 = vrot.slane %v1396_v17, %v3075_v15 }
 0xeda   :  { %v1437_v0 = vadd.f32 %v1400_v18, %v3038_v48  ;;  %v1438_v13 = vadd.f32 %v1404_v7, %v3036_v47  ;;  %v1444_v40 = vadd.f32 %v1428_v22, %v3854_v57  ;;  %v1439_v20 = vadd.f32 %v1408_v53, %v3034_v46 }
 0xedb   :  { %v1440_v38 = vadd.f32 %v1412_v25, %v3042_v51  ;;  %v1441_v61 = vadd.f32 %v1416_v29, %v3048_v55  ;;  %v1442_v6 = vadd.f32 %v1420_v58, %v3853_v26  ;;  %v1443_v52 = vadd.f32 %v1424_v45, %v3842_v63 }
 0xedc   :  { %2800 = vtanh.f32 %v1437_v0 }
 0xedd   :  { %2802 = vtanh.f32 %v1438_v13 }
 0xede   :  { %2804 = vtanh.f32 %v1444_v40 }
 0xedf   :  { %2806 = vtanh.f32 %v1439_v20 }
 0xee0   :  { %2808 = vtanh.f32 %v1440_v38 }
 0xee1   :  { %2810 = vtanh.f32 %v1441_v61 }
 0xee2   :  { %2812 = vtanh.f32 %v1442_v6 }
 0xee3   :  { %2814 = vtanh.f32 %v1443_v52 }
 0xee6   :  { %v2801_v41 = vpop.eup %2800 }
 0xee7   :  { %1462 = vperm.xlu1 %2703, %v2801_v41   ;;  %v2803_v27 = vpop.eup %2802 }
 0xee8   :  { %v2805_v19 = vpop.eup %2804 }
 0xee9   :  { %v2807_v43 = vpop.eup %2806  ;;  %1483 = vperm.xlu0 %2702, %v2805_v19  }
 0xeea   :  { %v2809_v8 = vpop.eup %2808 }
 0xeeb   :  { %1465 = vperm.xlu1 %2703, %v2803_v27   ;;  %v2811_v33 = vpop.eup %2810 }
 0xeec   :  { %v2813_v39 = vpop.eup %2812 }
 0xeed   :  { %v2815_v50 = vpop.eup %2814 }
 0xeef   :  { %1468 = vperm.xlu1 %2703, %v2807_v43  }
 0xef3   :  { %1471 = vperm.xlu1 %2703, %v2809_v8  }
 0xef7   :  { %1474 = vperm.xlu1 %2703, %v2811_v33  }
 0xefb   :  { %1477 = vperm.xlu1 %2703, %v2813_v39  }
 0xeff   :  { %1480 = vperm.xlu1 %2703, %v2815_v50  }
 0xf66   :  { %v1463_v17 = vpop.permute.xlu1 %1462 }
 0xf67   :  { %v1488_v40 = vrot.slane %v1463_v17, %v3855_v9 }
 0xf68   :  { %v1484_v58 = vpop.permute.xlu0 %1483 }
 0xf69   :  { %v1516_v43 = vrot.slane %v1484_v58, %v3855_v9 }
 0xf6a   :  { %v1466_v18 = vpop.permute.xlu1 %1465 }
 0xf6b   :  { %v1492_v53 = vrot.slane %v1466_v18, %v3855_v9 }
 0xf6d   :  { %v1517_v38 = vsel %vm451_vm0, %v1492_v53, %v1488_v40 }
 0xf6e   :  { %v1469_v7 = vpop.permute.xlu1 %1468 }
 0xf6f   :  { %v1496_v13 = vrot.slane %v1469_v7, %v3855_v9 }
 0xf71   :  { %v1518_v61 = vsel %vm453_vm2, %v1496_v13, %v1517_v38 }
 0xf72   :  { %v1472_v0 = vpop.permute.xlu1 %1471 }
 0xf73   :  { %v1500_v25 = vrot.slane %v1472_v0, %v3855_v9 }
 0xf75   :  { %v1519_v27 = vsel %vm455_vm3, %v1500_v25, %v1518_v61 }
 0xf76   :  { %v1475_v22 = vpop.permute.xlu1 %1474 }
 0xf77   :  { %v1504_v29 = vrot.slane %v1475_v22, %v3855_v9 }
 0xf79   :  { %v1520_v6 = vsel %vm457_vm4, %v1504_v29, %v1519_v27 }
 0xf7a   :  { %v1478_v20 = vpop.permute.xlu1 %1477 }
 0xf7b   :  { %v1508_v41 = vrot.slane %v1478_v20, %v3855_v9 }
 0xf7d   :  { %v1521_v52 = vsel %vm459_vm5, %v1508_v41, %v1520_v6 }
 0xf7e   :  { %v1481_v45 = vpop.permute.xlu1 %1480 }
 0xf7f   :  { %v1512_v19 = vrot.slane %v1481_v45, %v3855_v9 }
 0xf81   :  { %v1522_v8 = vsel %vm461_vm6, %v1512_v19, %v1521_v52 }
 0xf82   :  { %v1523_v33 = vsel %vm463_vm7, %v1516_v43, %v1522_v8 }
 0xf83   :  { %v1525_v39 = vsel %vm3100_vm8, %v1523_v33, -1e+30 }
 0xf84   :  { %v1526_v50 = vsel %vm467_vm9, %v1525_v39, -inf }
 0xf85   :  { %1527 = vmax.xlane.f32.xlu1 %v1526_v50 }
0x1012   :  { %v1528_v17 = vpop.xlane.xlu1 %1527 }
0x1013   :  { %v1529_v18 = vsub.f32 %v1525_v39, %v1528_v17 }
0x1015   :  { %v1530_v7 = vmul.f32 1.442695, %v1529_v18 }
0x1017   :  { %2816 = vpow2.f32 %v1530_v7 }
0x1021   :  { %v2817_v0 = vpop.eup %2816 }
0x1022   :  { %v1532_v22 = vsel %vm467_vm9, %v2817_v0, 0.0 }
0x1023   :  { %1533 = vadd.xlane.f32.xlu0 %v1532_v22 }
0x10b0   :  { %v1534_v53 = vpop.xlane.xlu0 %1533 }
0x10b1   :  { %2818 = vrcp.f32 %v1534_v53 }
0x10bb   :  { %v2819_v13 = vpop.eup %2818 }
0x10bc   :  { %v1536_v40 = vmul.f32 %v2819_v13, %v2817_v0 }
0x10be   :  { %v1547_v25 = vrot.slane %v1536_v40, %v3063_v2  ;;  %v1540_v20 = vrot.slane %v1536_v40, %v3046_v54  ;;  %v1589_v29 = vrot.slane %v1536_v40, %v3852_v34  ;;  %v1554_v38 = vrot.slane %v1536_v40, %v3050_v56 }
0x10bf   :  { %v1561_v41 = vrot.slane %v1536_v40, %v3054_v59  ;;  %v1568_v58 = vrot.slane %v1536_v40, %v3067_v5  ;;  %v1575_v61 = vrot.slane %v1536_v40, %v3071_v10  ;;  %v1582_v27 = vrot.slane %v1536_v40, %v3075_v15 }
0x10c0   :  { %1549 = vbcast.lane.b32.xlu0 %v1547_v25, 256  ;;  %1542 = vbcast.lane.b32.xlu1 %v1540_v20, 256 }
0x10c4   :  { %1591 = vbcast.lane.b32.xlu0 %v1589_v29, 256  ;;  %1556 = vbcast.lane.b32.xlu1 %v1554_v38, 256 }
0x10c8   :  { %1563 = vbcast.lane.b32.xlu1 %v1561_v41, 256 }
0x10cc   :  { %1570 = vbcast.lane.b32.xlu1 %v1568_v58, 256 }
0x10d0   :  { %1577 = vbcast.lane.b32.xlu1 %v1575_v61, 256 }
0x10d4   :  { %1584 = vbcast.lane.b32.xlu1 %v1582_v27, 256 }
0x1132   :  { %v1550_v45 = vpop.permute.xlu0 %1549  ;;  %v1543_v6 = vpop.permute.xlu1 %1542 }
0x1133   :  { %v1594_v19 = vmul.f32 %v1550_v45, %v3857_v21  ;;  %v1593_v43 = vmul.f32 %v1543_v6, %v3858_v36 }
0x1135   :  { %v1607_v8 = vrot.slane %v1594_v19, 4  ;;  %v1601_v39 = vrot.slane %v1593_v43, 4 }
0x1136   :  { %v1557_v52 = vpop.permute.xlu1 %1556  ;;  %v1592_v50 = vpop.permute.xlu0 %1591 }
0x1137   :  { %v1595_v33 = vmul.f32 %v1557_v52, %v3860_v28  ;;  %v1608_v7 = vadd.f32 %v1607_v8, %v1594_v19  ;;  %v1602_v0 = vadd.f32 %v1601_v39, %v1593_v43  ;;  %v1600_v22 = vmul.f32 %v1592_v50, %v3272_v24  ;;  %v3864_v28 = vld [vmem:[#allocation15_spill] sm:$0xff] }
0x1139   :  { %v1613_v17 = vrot.slane %v1595_v33, 4  ;;  %v1609_v20 = vrot.slane %v1608_v7, 2  ;;  %v1603_v29 = vrot.slane %v1602_v0, 2  ;;  %v1643_v38 = vrot.slane %v1600_v22, 4 }
0x113a   :  { %v1564_v18 = vpop.permute.xlu1 %1563 }
0x113b   :  { %v1596_v53 = vmul.f32 %v1564_v18, %v3861_v42  ;;  %v1614_v13 = vadd.f32 %v1613_v17, %v1595_v33  ;;  %v1610_v43 = vadd.f32 %v1609_v20, %v1608_v7  ;;  %v1604_v52 = vadd.f32 %v1603_v29, %v1602_v0 }
0x113c   :  { %v1644_v8 = vadd.f32 %v1643_v38, %v1600_v22 }
0x113d   :  { %v1619_v40 = vrot.slane %v1596_v53, 4  ;;  %v1615_v61 = vrot.slane %v1614_v13, 2 }
0x113e   :  { %v1571_v25 = vpop.permute.xlu1 %1570 }
0x113f   :  { %v1620_v41 = vadd.f32 %v1619_v40, %v1596_v53  ;;  %v1597_v58 = vmul.f32 %v1571_v25, %v3862_v14  ;;  %v1616_v50 = vadd.f32 %v1615_v61, %v1614_v13  ;;  %v1611_v40 = vrot.slane %v1610_v43, 1 }
0x1140   :  { %v1605_v25 = vrot.slane %v1604_v52, 1  ;;  %v1645_v14 = vrot.slane %v1644_v8, 2 }
0x1141   :  { %v1621_v27 = vrot.slane %v1620_v41, 2  ;;  %v1625_v45 = vrot.slane %v1597_v58, 4  ;;  %v1617_v36 = vrot.slane %v1616_v50, 1  ;;  %v1612_v20 = vadd.f32 %v1611_v40, %v1610_v43 }
0x1142   :  { %v1578_v6 = vpop.permute.xlu1 %1577  ;;  %v1606_v13 = vadd.f32 %v1605_v25, %v1604_v52  ;;  %v1646_v29 = vadd.f32 %v1645_v14, %v1644_v8 }
0x1143   :  { %v1598_v19 = vmul.f32 %v1578_v6, %v3859_v31  ;;  %v1626_v39 = vadd.f32 %v1625_v45, %v1597_v58  ;;  %v1622_v17 = vadd.f32 %v1621_v27, %v1620_v41  ;;  %v1618_v38 = vadd.f32 %v1617_v36, %v1616_v50 }
0x1144   :  { %v1657_v45 = vsel %vm451_vm0, %v1612_v20, %v1606_v13 }
0x1145   :  { %v1631_v33 = vrot.slane %v1598_v19, 4  ;;  %v1627_v18 = vrot.slane %v1626_v39, 2  ;;  %v1623_v6 = vrot.slane %v1622_v17, 1 }
0x1146   :  { %v1585_v24 = vpop.permute.xlu1 %1584 }
0x1147   :  { %v1632_v42 = vadd.f32 %v1631_v33, %v1598_v19  ;;  %v1599_v53 = vmul.f32 %v1585_v24, %v3864_v28  ;;  %v1628_v21 = vadd.f32 %v1627_v18, %v1626_v39  ;;  %v1624_v61 = vadd.f32 %v1623_v6, %v1622_v17 }
0x1148   :  { %v1647_v19 = vrot.slane %v1646_v29, 1  ;;  %v1658_v33 = vsel %vm453_vm2, %v1618_v38, %v1657_v45 }
0x1149   :  { %v1633_v49 = vrot.slane %v1632_v42, 2  ;;  %v1637_v9 = vrot.slane %v1599_v53, 4  ;;  %v1629_v7 = vrot.slane %v1628_v21, 1  ;;  %v1659_v28 = vsel %vm455_vm3, %v1624_v61, %v1658_v33 }
0x114b   :  { %v1634_v0 = vadd.f32 %v1633_v49, %v1632_v42  ;;  %v1638_v22 = vadd.f32 %v1637_v9, %v1599_v53  ;;  %v1630_v27 = vadd.f32 %v1629_v7, %v1628_v21  ;;  %v1648_v42 = vadd.f32 %v1647_v19, %v1646_v29 }
0x114d   :  { %v1635_v41 = vrot.slane %v1634_v0, 1  ;;  %v1639_v58 = vrot.slane %v1638_v22, 2  ;;  %v1660_v9 = vsel %vm457_vm4, %v1630_v27, %v1659_v28  ;;  %v2874_v28 = vld [vmem:[%s3782_s8 + $0x30] sm:$0xff]  }
0x114f   :  { %v1640_v24 = vadd.f32 %v1639_v58, %v1638_v22  ;;  %v1636_v39 = vadd.f32 %v1635_v41, %v1634_v0 }
0x1151   :  { %v1641_v18 = vrot.slane %v1640_v24, 1  ;;  %v1661_v36 = vsel %vm459_vm5, %v1636_v39, %v1660_v9 }
0x1153   :  { %v1642_v49 = vadd.f32 %v1641_v18, %v1640_v24 }
0x1155   :  { %v1662_v14 = vsel %vm461_vm6, %v1642_v49, %v1661_v36 }
0x1156   :  { %v1663_v21 = vsel %vm463_vm7, %v1648_v42, %v1662_v14 }
0x1157   :  { %v1665_v43 = vpack.c.bf16 %v1663_v21, %v1663_v21  ;;  %v3865_v21 = vld [vmem:[#allocation7_spill] sm:$0xff] }
0x1159   :  { %1700 = vmatmul.mubr.bf16.vlgmr.msra.gmra.mrb[12].mxu0 %v1665_v43 }
0x115a   :  { %2625 = vmatpush3.bf16.msra.mxu0 %v3452_v62  ;;  %v2875_v62 = vld [vmem:[%s3782_s8 + $0x78] sm:$0xff]  }
0x115b   :  { %2626 = vmatprep.subr.bf16.mxu0 %v3458_v60  ;;  %v2876_v60 = vld [vmem:[%s3782_s8 + $0x38] sm:$0xff]  }
0x115e   :  { %2627 = vmatpush3.bf16.msra.mxu0 %v3464_v12 }
0x115f   :  { %2628 = vmatprep.subr.bf16.mxu0 %v3470_v1 }
0x1162   :  { %2629 = vmatpush3.bf16.msra.mxu0 %v3476_v32 }
0x1163   :  { %2630 = vmatprep.subr.bf16.mxu0 %v3482_v35 }
0x1166   :  { %2631 = vmatpush3.bf16.msra.mxu0 %v3488_v4 }
0x1167   :  { %2632 = vmatprep.subr.bf16.mxu0 %v3494_v11  ;;  %v3609_v11 = vld [vmem:[%s3783_s9] ss:$0 sm:$0xff] }
0x116a   :  { %2633 = vmatpush3.bf16.msra.mxu0 %v3500_v44 }
0x116b   :  { %2634 = vmatprep.subr.bf16.mxu0 %v3506_v37 }
0x116e   :  { %2635 = vmatpush3.bf16.msra.mxu0 %v3512_v30 }
0x116f   :  { %2636 = vmatprep.subr.bf16.mxu0 %v3518_v23 }
0x1172   :  { %2637 = vmatpush3.bf16.msra.mxu0 %v2874_v28 }
0x1173   :  { %2638 = vmatprep.subr.bf16.mxu0 %v2875_v62 }
0x1176   :  { %2639 = vmatpush3.bf16.msra.mxu0 %v2876_v60 }
0x122c   :  { %v2596_v12 = vpop.f32.mrb[12].mxu0 }
0x122d   :  { %v2597_v1 = vpop.f32.mrb[13].mxu0 }
0x122e   :  { %v2598_v32 = vadd.f32 %v2597_v1, %v2596_v12  ;;  %v2599_v35 = vpop.f32.mrb[14].mxu0 }
0x122f   :  { %v2600_v4 = vpop.f32.mrb[15].mxu0 }
0x1230   :  { %v1702_v44 = vadd.f32 %v3609_v11, %v2598_v32 }
0x1232   :  { %v1984_v37 = vpack.c.bf16 %v1702_v44, %v1702_v44  ;;  %v1707_v30 = vmul.f32 %v3385_v3, %v1702_v44 }
0x1234   :  { %2017 = vmatprep.mubr.bf16.mxu1 %v1984_v37  ;;  %1708 = vadd.xlane.f32.xlu1 %v1707_v30 }
0x12c1   :  { %v1709_v23 = vpop.xlane.xlu1 %1708 }
0x12c2   :  { %v1710_v52 = vadd.f32 %v3388_v16, %v1709_v23 }
0x12c4   :  { %1713 = vperm.xlu0 %2702, %v1710_v52  }
0x1343   :  { %v1714_v8 = vpop.permute.xlu0 %1713 }
0x1344   :  { %v1718_v50 = vrot.slane %v1714_v8, %v3046_v54  ;;  %v1722_v17 = vrot.slane %v1714_v8, %v3063_v2  ;;  %v1726_v40 = vrot.slane %v1714_v8, %v3050_v56  ;;  %v1730_v3 = vrot.slane %v1714_v8, %v3054_v59 }
0x1345   :  { %v1734_v16 = vrot.slane %v1714_v8, %v3067_v5  ;;  %v1738_v22 = vrot.slane %v1714_v8, %v3071_v10  ;;  %v1742_v29 = vrot.slane %v1714_v8, %v3075_v15  ;;  %v1746_v58 = vrot.slane %v1714_v8, %v3852_v34 }
0x1346   :  { %v1755_v53 = vadd.f32 %v1718_v50, %v3038_v48  ;;  %v1756_v25 = vadd.f32 %v1722_v17, %v3036_v47  ;;  %v1757_v6 = vadd.f32 %v1726_v40, %v3034_v46  ;;  %v1758_v7 = vadd.f32 %v1730_v3, %v3042_v51 }
0x1347   :  { %v1759_v20 = vadd.f32 %v1734_v16, %v3048_v55  ;;  %v1760_v38 = vadd.f32 %v1738_v22, %v3853_v26  ;;  %v1761_v61 = vadd.f32 %v1742_v29, %v3842_v63  ;;  %v1762_v24 = vadd.f32 %v1746_v58, %v3854_v57 }
0x1348   :  { %2820 = vtanh.f32 %v1755_v53 }
0x1349   :  { %2822 = vtanh.f32 %v1756_v25 }
0x134a   :  { %2824 = vtanh.f32 %v1757_v6 }
0x134b   :  { %2826 = vtanh.f32 %v1758_v7 }
0x134c   :  { %2828 = vtanh.f32 %v1759_v20 }
0x134d   :  { %2830 = vtanh.f32 %v1760_v38 }
0x134e   :  { %2832 = vtanh.f32 %v1761_v61 }
0x134f   :  { %2834 = vtanh.f32 %v1762_v24 }
0x1352   :  { %v2821_v0 = vpop.eup %2820 }
0x1353   :  { %1780 = vperm.xlu0 %2702, %v2821_v0   ;;  %v2823_v13 = vpop.eup %2822 }
0x1354   :  { %v2825_v41 = vpop.eup %2824 }
0x1355   :  { %v2827_v27 = vpop.eup %2826 }
0x1356   :  { %v2829_v45 = vpop.eup %2828 }
0x1357   :  { %1783 = vperm.xlu0 %2702, %v2823_v13   ;;  %v2831_v19 = vpop.eup %2830 }
0x1358   :  { %v2833_v39 = vpop.eup %2832 }
0x1359   :  { %v2835_v33 = vpop.eup %2834 }
0x135b   :  { %1786 = vperm.xlu0 %2702, %v2825_v41  }
0x135f   :  { %1789 = vperm.xlu0 %2702, %v2827_v27  }
0x1363   :  { %1792 = vperm.xlu0 %2702, %v2829_v45  }
0x1367   :  { %1795 = vperm.xlu0 %2702, %v2831_v19  }
0x136b   :  { %1798 = vperm.xlu0 %2702, %v2833_v39   ;;  %v3867_v39 = vld [vmem:[#allocation9_spill] sm:$0xff] }
0x136f   :  { %1801 = vperm.xlu0 %2702, %v2835_v33  }
0x13d2   :  { %v1781_v18 = vpop.permute.xlu0 %1780 }
0x13d3   :  { %v1806_v62 = vrot.slane %v1781_v18, %v3865_v21 }
0x13d6   :  { %v1784_v9 = vpop.permute.xlu0 %1783 }
0x13d7   :  { %v1810_v43 = vrot.slane %v1784_v9, %v3865_v21  ;;  %v3868_v9 = vld [vmem:[#allocation10_spill] sm:$0xff] }
0x13d9   :  { %v1835_v32 = vsel %vm451_vm0, %v1810_v43, %v1806_v62 }
0x13da   :  { %v1787_v49 = vpop.permute.xlu0 %1786 }
0x13db   :  { %v1814_v28 = vrot.slane %v1787_v49, %v3865_v21 }
0x13dd   :  { %v1836_v4 = vsel %vm453_vm2, %v1814_v28, %v1835_v32  ;;  %v3869_v28 = vld [vmem:[#allocation11_spill] sm:$0xff] }
0x13de   :  { %v1790_v42 = vpop.permute.xlu0 %1789 }
0x13df   :  { %v1818_v60 = vrot.slane %v1790_v42, %v3865_v21 }
0x13e1   :  { %v1837_v37 = vsel %vm455_vm3, %v1818_v60, %v1836_v4 }
0x13e2   :  { %v1793_v36 = vpop.permute.xlu0 %1792 }
0x13e3   :  { %v1822_v12 = vrot.slane %v1793_v36, %v3865_v21 }
0x13e5   :  { %v1838_v30 = vsel %vm457_vm4, %v1822_v12, %v1837_v37  ;;  %v3870_v37 = vld [vmem:[#allocation12_spill] sm:$0xff] }
0x13e6   :  { %v1796_v14 = vpop.permute.xlu0 %1795 }
0x13e7   :  { %v1826_v35 = vrot.slane %v1796_v14, %v3865_v21 }
0x13e9   :  { %v1839_v52 = vsel %vm459_vm5, %v1826_v35, %v1838_v30 }
0x13ea   :  { %v1799_v1 = vpop.permute.xlu0 %1798 }
0x13eb   :  { %v1830_v44 = vrot.slane %v1799_v1, %v3865_v21 }
0x13ed   :  { %v1840_v50 = vsel %vm461_vm6, %v1830_v44, %v1839_v52 }
0x13ee   :  { %v1802_v23 = vpop.permute.xlu0 %1801 }
0x13ef   :  { %v1834_v8 = vrot.slane %v1802_v23, %v3865_v21 }
0x13f1   :  { %v1841_v17 = vsel %vm463_vm7, %v1834_v8, %v1840_v50 }
0x13f2   :  { %v1843_v40 = vsel %vm3100_vm8, %v1841_v17, -1e+30 }
0x13f3   :  { %v1844_v25 = vsel %vm467_vm9, %v1843_v40, -inf }
0x13f4   :  { %1845 = vmax.xlane.f32.xlu1 %v1844_v25 }
0x1481   :  { %v1846_v3 = vpop.xlane.xlu1 %1845 }
0x1482   :  { %v1847_v6 = vsub.f32 %v1843_v40, %v1846_v3  ;;  %v3871_v40 = vld [vmem:[#allocation13_spill] sm:$0xff] }
0x1484   :  { %v1848_v16 = vmul.f32 1.442695, %v1847_v6 }
0x1486   :  { %2836 = vpow2.f32 %v1848_v16 }
0x1490   :  { %v2837_v7 = vpop.eup %2836 }
0x1491   :  { %v1850_v0 = vsel %vm467_vm9, %v2837_v7, 0.0 }
0x1492   :  { %1851 = vadd.xlane.f32.xlu0 %v1850_v0 }
0x151f   :  { %v1852_v22 = vpop.xlane.xlu0 %1851 }
0x1520   :  { %2838 = vrcp.f32 %v1852_v22 }
0x152a   :  { %v2839_v20 = vpop.eup %2838 }
0x152b   :  { %v1854_v13 = vmul.f32 %v2839_v20, %v2837_v7 }
0x152d   :  { %v1893_v29 = vrot.slane %v1854_v13, %v3071_v10  ;;  %v1858_v38 = vrot.slane %v1854_v13, %v3046_v54  ;;  %v1865_v41 = vrot.slane %v1854_v13, %v3063_v2  ;;  %v1872_v58 = vrot.slane %v1854_v13, %v3050_v56 }
0x152e   :  { %v1879_v61 = vrot.slane %v1854_v13, %v3054_v59  ;;  %v1886_v27 = vrot.slane %v1854_v13, %v3067_v5  ;;  %v1900_v24 = vrot.slane %v1854_v13, %v3075_v15  ;;  %v1907_v45 = vrot.slane %v1854_v13, %v3852_v34 }
0x152f   :  { %1895 = vbcast.lane.b32.xlu0 %v1893_v29, 256  ;;  %1860 = vbcast.lane.b32.xlu1 %v1858_v38, 256  ;;  %v3872_v38 = vld [vmem:[#allocation15_spill] sm:$0xff] }
0x1533   :  { %1867 = vbcast.lane.b32.xlu1 %v1865_v41, 256 }
0x1537   :  { %1874 = vbcast.lane.b32.xlu1 %v1872_v58, 256 }
0x153b   :  { %1881 = vbcast.lane.b32.xlu1 %v1879_v61, 256 }
0x153f   :  { %1888 = vbcast.lane.b32.xlu1 %v1886_v27, 256 }
0x1543   :  { %1902 = vbcast.lane.b32.xlu1 %v1900_v24, 256 }
0x1547   :  { %1909 = vbcast.lane.b32.xlu1 %v1907_v45, 256 }
0x15a1   :  { %v1861_v19 = vpop.permute.xlu1 %1860  ;;  %v1896_v42 = vpop.permute.xlu0 %1895 }
0x15a2   :  { %v1911_v33 = vmul.f32 %v1861_v19, %v3867_v39  ;;  %v1916_v60 = vmul.f32 %v1896_v42, %v3859_v31 }
0x15a4   :  { %v1919_v14 = vrot.slane %v1911_v33, 4  ;;  %v1949_v44 = vrot.slane %v1916_v60, 4 }
0x15a5   :  { %v1868_v18 = vpop.permute.xlu1 %1867 }
0x15a6   :  { %v1912_v49 = vmul.f32 %v1868_v18, %v3868_v9  ;;  %v1920_v32 = vadd.f32 %v1919_v14, %v1911_v33  ;;  %v1950_v3 = vadd.f32 %v1949_v44, %v1916_v60  ;;  %v3873_v14 = vld [vmem:[#allocation16_spill] sm:$0xff] }
0x15a8   :  { %v1925_v36 = vrot.slane %v1912_v49, 4  ;;  %v1921_v52 = vrot.slane %v1920_v32, 2  ;;  %v1951_v58 = vrot.slane %v1950_v3, 2 }
0x15a9   :  { %v1875_v43 = vpop.permute.xlu1 %1874 }
0x15aa   :  { %v1913_v62 = vmul.f32 %v1875_v43, %v3869_v28  ;;  %v1926_v12 = vadd.f32 %v1925_v36, %v1912_v49  ;;  %v1922_v0 = vadd.f32 %v1921_v52, %v1920_v32 }
0x15ac   :  { %v1931_v1 = vrot.slane %v1913_v62, 4  ;;  %v1927_v23 = vrot.slane %v1926_v12, 2  ;;  %v1923_v19 = vrot.slane %v1922_v0, 1 }
0x15ad   :  { %v1882_v35 = vpop.permute.xlu1 %1881 }
0x15ae   :  { %v1932_v4 = vadd.f32 %v1931_v1, %v1913_v62  ;;  %v1914_v30 = vmul.f32 %v1882_v35, %v3870_v37  ;;  %v1928_v16 = vadd.f32 %v1927_v23, %v1926_v12  ;;  %v1952_v62 = vadd.f32 %v1951_v58, %v1950_v3 }
0x15b0   :  { %v1933_v8 = vrot.slane %v1932_v4, 2  ;;  %v1937_v50 = vrot.slane %v1914_v30, 4  ;;  %v1929_v27 = vrot.slane %v1928_v16, 1 }
0x15b1   :  { %v1889_v17 = vpop.permute.xlu1 %1888 }
0x15b2   :  { %v1915_v25 = vmul.f32 %v1889_v17, %v3871_v40  ;;  %v1938_v6 = vadd.f32 %v1937_v50, %v1914_v30  ;;  %v1934_v22 = vadd.f32 %v1933_v8, %v1932_v4  ;;  %v1930_v60 = vadd.f32 %v1929_v27, %v1928_v16 }
0x15b3   :  { %v1924_v4 = vadd.f32 %v1923_v19, %v1922_v0  ;;  %v1953_v8 = vrot.slane %v1952_v62, 1 }
0x15b4   :  { %v1943_v7 = vrot.slane %v1915_v25, 4  ;;  %v1939_v20 = vrot.slane %v1938_v6, 2  ;;  %v1935_v33 = vrot.slane %v1934_v22, 1 }
0x15b5   :  { %v1903_v13 = vpop.permute.xlu1 %1902  ;;  %v1975_v50 = vsel %vm451_vm0, %v1930_v60, %v1924_v4 }
0x15b6   :  { %v1944_v29 = vadd.f32 %v1943_v7, %v1915_v25  ;;  %v1917_v41 = vmul.f32 %v1903_v13, %v3872_v38  ;;  %v1940_v61 = vadd.f32 %v1939_v20, %v1938_v6  ;;  %v1936_v35 = vadd.f32 %v1935_v33, %v1934_v22 }
0x15b7   :  { %v1954_v13 = vadd.f32 %v1953_v8, %v1952_v62  ;;  %v2879_v62 = vld [vmem:[#allocation2] ss:$0 sm:$0xff] }
0x15b8   :  { %v1945_v24 = vrot.slane %v1944_v29, 2  ;;  %v1955_v45 = vrot.slane %v1917_v41, 4  ;;  %v1941_v49 = vrot.slane %v1940_v61, 1  ;;  %v1976_v6 = vsel %vm453_vm2, %v1936_v35, %v1975_v50 }
0x15b9   :  { %v1910_v18 = vpop.permute.xlu1 %1909 }
0x15ba   :  { %v1946_v42 = vadd.f32 %v1945_v24, %v1944_v29  ;;  %v1956_v36 = vadd.f32 %v1955_v45, %v1917_v41  ;;  %v1918_v43 = vmul.f32 %v1910_v18, %v3873_v14  ;;  %v1942_v44 = vadd.f32 %v1941_v49, %v1940_v61 }
0x15bc   :  { %v1947_v12 = vrot.slane %v1946_v42, 1  ;;  %v1957_v1 = vrot.slane %v1956_v36, 2  ;;  %v1961_v32 = vrot.slane %v1918_v43, 4  ;;  %v1977_v7 = vsel %vm455_vm3, %v1942_v44, %v1976_v6 }
0x15be   :  { %v1958_v30 = vadd.f32 %v1957_v1, %v1956_v36  ;;  %v1962_v23 = vadd.f32 %v1961_v32, %v1918_v43  ;;  %v1948_v52 = vadd.f32 %v1947_v12, %v1946_v42  ;;  %v2878_v42 = vld [vmem:[%s3777_s6] ss:$0 sm:$0xff] }
0x15c0   :  { %v1959_v17 = vrot.slane %v1958_v30, 1  ;;  %v1963_v25 = vrot.slane %v1962_v23, 2  ;;  %v1978_v16 = vsel %vm457_vm4, %v1948_v52, %v1977_v7 }
0x15c1   :  { %v1979_v29 = vsel %vm459_vm5, %v1954_v13, %v1978_v16 }
0x15c2   :  { %v1964_v3 = vadd.f32 %v1963_v25, %v1962_v23  ;;  %v1960_v20 = vadd.f32 %v1959_v17, %v1958_v30 }
0x15c4   :  { %v1965_v22 = vrot.slane %v1964_v3, 1  ;;  %v1980_v41 = vsel %vm461_vm6, %v1960_v20, %v1979_v29 }
0x15c6   :  { %v1966_v0 = vadd.f32 %v1965_v22, %v1964_v3 }
0x15c8   :  { %v1981_v58 = vsel %vm463_vm7, %v1966_v0, %v1980_v41 }
0x15c9   :  { %v1983_v61 = vpack.c.bf16 %v1981_v58, %v1981_v58 }
0x15cb   :  { %2018 = vmatmul.mubr.bf16.vlgmr.msra.gmra.mrb[8].mxu1 %v1983_v61 }
0x169e   :  { %v2618_v27 = vpop.f32.mrb[8].mxu1 }
0x169f   :  { %v2619_v24 = vpop.f32.mrb[9].mxu1 }
0x16a0   :  { %v2620_v45 = vadd.f32 %v2619_v24, %v2618_v27  ;;  %v2621_v19 = vpop.f32.mrb[10].mxu1 }
0x16a1   :  { %v2622_v33 = vpop.f32.mrb[11].mxu1 }
0x16a2   :  { %v2020_v18 = vadd.f32 %v3609_v11, %v2620_v45 }
0x16a4   :  { %v2302_v49 = vpack.c.bf16 %v2020_v18, %v2020_v18  ;;  %v2025_v36 = vmul.f32 %v2878_v42, %v2020_v18 }
0x16a6   :  { %2335 = vmatprep.mubr.bf16.mxu0 %v2302_v49  ;;  %2026 = vadd.xlane.f32.xlu1 %v2025_v36 }
0x1733   :  { %v2027_v43 = vpop.xlane.xlu1 %2026 }
0x1734   :  { %v2028_v60 = vadd.f32 %v2879_v62, %v2027_v43 }
0x1736   :  { %2031 = vperm.xlu0 %2702, %v2028_v60  }
0x17b5   :  { %v2032_v12 = vpop.permute.xlu0 %2031 }
0x17b6   :  { %v2036_v1 = vrot.slane %v2032_v12, %v3046_v54  ;;  %v2040_v32 = vrot.slane %v2032_v12, %v3063_v2  ;;  %v2060_v35 = vrot.slane %v2032_v12, %v3075_v15  ;;  %v2044_v44 = vrot.slane %v2032_v12, %v3050_v56 }
0x17b7   :  { %v2048_v52 = vrot.slane %v2032_v12, %v3054_v59  ;;  %v2052_v50 = vrot.slane %v2032_v12, %v3067_v5  ;;  %v2064_v7 = vrot.slane %v2032_v12, %v3852_v34 }
0x17b8   :  { %v2073_v4 = vadd.f32 %v2036_v1, %v3038_v48  ;;  %v2074_v30 = vadd.f32 %v2040_v32, %v3036_v47  ;;  %v2079_v23 = vadd.f32 %v2060_v35, %v3842_v63  ;;  %v2075_v8 = vadd.f32 %v2044_v44, %v3034_v46 }
0x17b9   :  { %v2076_v17 = vadd.f32 %v2048_v52, %v3042_v51  ;;  %v2056_v48 = vrot.slane %v2032_v12, %v3071_v10  ;;  %v2077_v47 = vadd.f32 %v2052_v50, %v3048_v55  ;;  %v2080_v51 = vadd.f32 %v2064_v7, %v3854_v57 }
0x17ba   :  { %2840 = vtanh.f32 %v2073_v4 }
0x17bb   :  { %2842 = vtanh.f32 %v2074_v30  ;;  %v2078_v46 = vadd.f32 %v2056_v48, %v3853_v26 }
0x17bc   :  { %2844 = vtanh.f32 %v2079_v23 }
0x17bd   :  { %2846 = vtanh.f32 %v2075_v8 }
0x17be   :  { %2848 = vtanh.f32 %v2076_v17 }
0x17bf   :  { %2850 = vtanh.f32 %v2077_v47 }
0x17c0   :  { %2852 = vtanh.f32 %v2078_v46 }
0x17c1   :  { %2854 = vtanh.f32 %v2080_v51 }
0x17c4   :  { %v2841_v25 = vpop.eup %2840 }
0x17c5   :  { %2098 = vperm.xlu0 %2702, %v2841_v25   ;;  %v2843_v6 = vpop.eup %2842 }
0x17c6   :  { %v2845_v63 = vpop.eup %2844 }
0x17c7   :  { %2116 = vperm.xlu1 %2703, %v2845_v63   ;;  %v2847_v3 = vpop.eup %2846 }
0x17c8   :  { %v2849_v16 = vpop.eup %2848 }
0x17c9   :  { %2101 = vperm.xlu0 %2702, %v2843_v6   ;;  %v2851_v20 = vpop.eup %2850 }
0x17ca   :  { %v2853_v55 = vpop.eup %2852 }
0x17cb   :  { %v2855_v13 = vpop.eup %2854 }
0x17cd   :  { %2104 = vperm.xlu0 %2702, %v2847_v3  }
0x17d1   :  { %2107 = vperm.xlu0 %2702, %v2849_v16  }
0x17d5   :  { %2110 = vperm.xlu0 %2702, %v2851_v20  }
0x17d9   :  { %2113 = vperm.xlu0 %2702, %v2853_v55  }
0x17dd   :  { %2119 = vperm.xlu0 %2702, %v2855_v13  }
0x1844   :  { %v2099_v22 = vpop.permute.xlu0 %2098 }
0x1845   :  { %v2124_v57 = vrot.slane %v2099_v22, %v3865_v21 }
0x1846   :  { %v2117_v18 = vpop.permute.xlu1 %2116 }
0x1847   :  { %v2148_v62 = vrot.slane %v2117_v18, %v3865_v21 }
0x1848   :  { %v2102_v0 = vpop.permute.xlu0 %2101 }
0x1849   :  { %v2128_v41 = vrot.slane %v2102_v0, %v3865_v21 }
0x184b   :  { %v2153_v45 = vsel %vm451_vm0, %v2128_v41, %v2124_v57 }
0x184c   :  { %v2105_v29 = vpop.permute.xlu0 %2104 }
0x184d   :  { %v2132_v58 = vrot.slane %v2105_v29, %v3865_v21 }
0x184f   :  { %v2154_v19 = vsel %vm453_vm2, %v2132_v58, %v2153_v45 }
0x1850   :  { %v2108_v26 = vpop.permute.xlu0 %2107 }
0x1851   :  { %v2136_v27 = vrot.slane %v2108_v26, %v3865_v21 }
0x1853   :  { %v2155_v49 = vsel %vm455_vm3, %v2136_v27, %v2154_v19 }
0x1854   :  { %v2111_v61 = vpop.permute.xlu0 %2110 }
0x1855   :  { %v2140_v24 = vrot.slane %v2111_v61, %v3865_v21 }
0x1857   :  { %v2156_v36 = vsel %vm457_vm4, %v2140_v24, %v2155_v49 }
0x1858   :  { %v2114_v33 = vpop.permute.xlu0 %2113 }
0x1859   :  { %v2144_v42 = vrot.slane %v2114_v33, %v3865_v21 }
0x185b   :  { %v2157_v43 = vsel %vm459_vm5, %v2144_v42, %v2156_v36 }
0x185c   :  { %v2120_v60 = vpop.permute.xlu0 %2119  ;;  %v2158_v1 = vsel %vm461_vm6, %v2148_v62, %v2157_v43 }
0x185d   :  { %v2152_v12 = vrot.slane %v2120_v60, %v3865_v21 }
0x185f   :  { %v2159_v32 = vsel %vm463_vm7, %v2152_v12, %v2158_v1 }
0x1860   :  { %v2161_v35 = vsel %vm3100_vm8, %v2159_v32, -1e+30 }
0x1861   :  { %v2162_v4 = vsel %vm467_vm9, %v2161_v35, -inf }
0x1862   :  { %2163 = vmax.xlane.f32.xlu0 %v2162_v4 }
0x18ef   :  { %v2164_v44 = vpop.xlane.xlu0 %2163 }
0x18f0   :  { %v2165_v30 = vsub.f32 %v2161_v35, %v2164_v44 }
0x18f2   :  { %v2166_v23 = vmul.f32 1.442695, %v2165_v30 }
0x18f4   :  { %2856 = vpow2.f32 %v2166_v23 }
0x18fe   :  { %v2857_v52 = vpop.eup %2856 }
0x18ff   :  { %v2168_v8 = vsel %vm467_vm9, %v2857_v52, 0.0 }
0x1900   :  { %2169 = vadd.xlane.f32.xlu1 %v2168_v8 }
0x198d   :  { %v2170_v50 = vpop.xlane.xlu1 %2169 }
0x198e   :  { %2858 = vrcp.f32 %v2170_v50 }
0x1998   :  { %v2859_v21 = vpop.eup %2858 }
0x1999   :  { %v2172_v17 = vmul.f32 %v2859_v21, %v2857_v52 }
0x199b   :  { %v2183_v25 = vrot.slane %v2172_v17, %v3063_v2  ;;  %v2176_v53 = vrot.slane %v2172_v17, %v3046_v54  ;;  %v2211_v48 = vrot.slane %v2172_v17, %v3071_v10  ;;  %v2190_v47 = vrot.slane %v2172_v17, %v3050_v56  ;;  %v2732_v56 = vld [vmem:[%s3784_s10] sm:$0xff]   ;;  %v2735_v10 = vld [vmem:[%s3784_s10 + $0x18] sm:$0xff]  }
0x199c   :  { %v2225_v6 = vrot.slane %v2172_v17, %v3852_v34  ;;  %v2197_v63 = vrot.slane %v2172_v17, %v3054_v59  ;;  %v2204_v7 = vrot.slane %v2172_v17, %v3067_v5  ;;  %v2218_v2 = vrot.slane %v2172_v17, %v3075_v15  ;;  %v2733_v59 = vld [vmem:[%s3784_s10 + $0x8] sm:$0xff]   ;;  %v2734_v5 = vld [vmem:[%s3784_s10 + $0x10] sm:$0xff]   ;;  %v2736_v15 = vld [vmem:[%s3784_s10 + $0x20] sm:$0xff]  }
0x199d   :  { %2185 = vbcast.lane.b32.xlu1 %v2183_v25, 256  ;;  %2178 = vbcast.lane.b32.xlu0 %v2176_v53, 256  ;;  %v2881_v54 = vmov 0.0   ;;  %v2737_v34 = vld [vmem:[%s3784_s10 + $0x28] sm:$0xff]  }
0x199e   :  { %2679 = vmatprep.subr.bf16.mxu1 %v2881_v54  ;;  %2695 = vmatprep.mubr.msk.bf16.mxu1 %vm2882_vm10, %v2881_v54 }
0x199f   :  { %2680 = vmatpush3.bf16.msra.mxu1 %v2732_v56 }
0x19a0   :  { %2681 = vmatprep.subr.bf16.mxu1 %v2881_v54 }
0x19a1   :  { %2213 = vbcast.lane.b32.xlu1 %v2211_v48, 256  ;;  %2192 = vbcast.lane.b32.xlu0 %v2190_v47, 256 }
0x19a3   :  { %2682 = vmatpush3.bf16.msra.mxu1 %v2733_v59 }
0x19a4   :  { %2683 = vmatprep.subr.bf16.mxu1 %v2881_v54 }
0x19a5   :  { %2227 = vbcast.lane.b32.xlu1 %v2225_v6, 256  ;;  %2199 = vbcast.lane.b32.xlu0 %v2197_v63, 256 }
0x19a7   :  { %2684 = vmatpush3.bf16.msra.mxu1 %v2734_v5 }
0x19a8   :  { %2685 = vmatprep.subr.bf16.mxu1 %v2881_v54 }
0x19a9   :  { %2206 = vbcast.lane.b32.xlu0 %v2204_v7, 256 }
0x19ab   :  { %2686 = vmatpush3.bf16.msra.mxu1 %v2735_v10 }
0x19ac   :  { %2687 = vmatprep.subr.bf16.mxu1 %v2881_v54 }
0x19ad   :  { %2220 = vbcast.lane.b32.xlu0 %v2218_v2, 256 }
0x19af   :  { %2688 = vmatpush3.bf16.msra.mxu1 %v2736_v15 }
0x19b0   :  { %2689 = vmatprep.subr.bf16.mxu1 %v2881_v54 }
0x19b3   :  { %2690 = vmatpush3.bf16.msra.mxu1 %v2737_v34 }
0x19b4   :  { %2691 = vmatprep.subr.bf16.mxu1 %v2881_v54 }
0x1a0f   :  { %v2186_v46 = vpop.permute.xlu1 %2185  ;;  %v2179_v3 = vpop.permute.xlu0 %2178 }
0x1a10   :  { %v2230_v51 = vmul.f32 %v2186_v46, %v3868_v9  ;;  %v2229_v16 = vmul.f32 %v2179_v3, %v3867_v39 }
0x1a12   :  { %v2243_v20 = vrot.slane %v2230_v51, 4  ;;  %v2237_v55 = vrot.slane %v2229_v16, 4 }
0x1a13   :  { %v2214_v13 = vpop.permute.xlu1 %2213  ;;  %v2193_v22 = vpop.permute.xlu0 %2192 }
0x1a14   :  { %v2244_v0 = vadd.f32 %v2243_v20, %v2230_v51  ;;  %v2238_v29 = vadd.f32 %v2237_v55, %v2229_v16  ;;  %v2234_v26 = vmul.f32 %v2214_v13, %v3859_v31  ;;  %v2231_v41 = vmul.f32 %v2193_v22, %v3869_v28 }
0x1a16   :  { %v2249_v58 = vrot.slane %v2231_v41, 4  ;;  %v2267_v61 = vrot.slane %v2234_v26, 4  ;;  %v2245_v24 = vrot.slane %v2244_v0, 2  ;;  %v2239_v45 = vrot.slane %v2238_v29, 2 }
0x1a17   :  { %v2228_v57 = vpop.permute.xlu1 %2227  ;;  %v2200_v27 = vpop.permute.xlu0 %2199 }
0x1a18   :  { %v2250_v19 = vadd.f32 %v2249_v58, %v2231_v41  ;;  %v2236_v9 = vmul.f32 %v2228_v57, %v3873_v14  ;;  %v2232_v39 = vmul.f32 %v2200_v27, %v3870_v37  ;;  %v2268_v18 = vadd.f32 %v2267_v61, %v2234_v26  ;;  %v2738_v26 = vld [vmem:[%s3784_s10 + $0x30] sm:$0xff]   ;;  %v2739_v41 = vld [vmem:[%s3784_s10 + $0x38] sm:$0xff]  }
0x1a19   :  { %v2246_v43 = vadd.f32 %v2245_v24, %v2244_v0  ;;  %v2240_v31 = vadd.f32 %v2239_v45, %v2238_v29  ;;  %2692 = vmatpush3.bf16.msra.mxu1 %v2738_v26 }
0x1a1a   :  { %v2251_v33 = vrot.slane %v2250_v19, 2  ;;  %v2279_v49 = vrot.slane %v2236_v9, 4  ;;  %v2255_v42 = vrot.slane %v2232_v39, 4  ;;  %v2269_v1 = vrot.slane %v2268_v18, 2  ;;  %2693 = vmatprep.subr.bf16.mxu1 %v2881_v54 }
0x1a1b   :  { %v2207_v36 = vpop.permute.xlu0 %2206  ;;  %v2247_v44 = vrot.slane %v2246_v43, 1  ;;  %v2241_v14 = vrot.slane %v2240_v31, 1 }
0x1a1c   :  { %v2252_v62 = vadd.f32 %v2251_v33, %v2250_v19  ;;  %v2280_v28 = vadd.f32 %v2279_v49, %v2236_v9  ;;  %v2256_v60 = vadd.f32 %v2255_v42, %v2232_v39  ;;  %v2233_v12 = vmul.f32 %v2207_v36, %v3871_v40  ;;  %v2493_v9 = vld [vmem:[%s3785_s11] ss:$0 sm:$0xff] }
0x1a1d   :  { %v2270_v21 = vadd.f32 %v2269_v1, %v2268_v18  ;;  %v2248_v53 = vadd.f32 %v2247_v44, %v2246_v43  ;;  %v2242_v48 = vadd.f32 %v2241_v14, %v2240_v31  ;;  %2694 = vmatpush3.bf16.msra.mxu1 %v2739_v41 }
0x1a1e   :  { %v2257_v32 = vrot.slane %v2256_v60, 2  ;;  %v2261_v35 = vrot.slane %v2233_v12, 4  ;;  %v2253_v30 = vrot.slane %v2252_v62, 1  ;;  %v2281_v23 = vrot.slane %v2280_v28, 2 }
0x1a1f   :  { %v2221_v4 = vpop.permute.xlu0 %2220  ;;  %v2271_v56 = vrot.slane %v2270_v21, 1 }
0x1a20   :  { %v2235_v37 = vmul.f32 %v2221_v4, %v3872_v38  ;;  %v2258_v52 = vadd.f32 %v2257_v32, %v2256_v60  ;;  %v2262_v8 = vadd.f32 %v2261_v35, %v2233_v12  ;;  %v2254_v40 = vadd.f32 %v2253_v30, %v2252_v62 }
0x1a21   :  { %v2282_v6 = vadd.f32 %v2281_v23, %v2280_v28  ;;  %v2293_v38 = vsel %vm451_vm0, %v2248_v53, %v2242_v48  ;;  %v2272_v51 = vadd.f32 %v2271_v56, %v2270_v21 }
0x1a22   :  { %v2273_v50 = vrot.slane %v2235_v37, 4  ;;  %v2259_v17 = vrot.slane %v2258_v52, 1  ;;  %v2263_v25 = vrot.slane %v2262_v8, 2  ;;  %v2294_v10 = vsel %vm453_vm2, %v2254_v40, %v2293_v38 }
0x1a23   :  { %v2283_v15 = vrot.slane %v2282_v6, 1 }
0x1a24   :  { %v2274_v47 = vadd.f32 %v2273_v50, %v2235_v37  ;;  %v2264_v63 = vadd.f32 %v2263_v25, %v2262_v8  ;;  %v2260_v7 = vadd.f32 %v2259_v17, %v2258_v52 }
0x1a25   :  { %v2284_v55 = vadd.f32 %v2283_v15, %v2282_v6 }
0x1a26   :  { %v2275_v2 = vrot.slane %v2274_v47, 2  ;;  %v2265_v59 = vrot.slane %v2264_v63, 1  ;;  %v2295_v46 = vsel %vm455_vm3, %v2260_v7, %v2294_v10 }
0x1a28   :  { %v2276_v5 = vadd.f32 %v2275_v2, %v2274_v47  ;;  %v2266_v34 = vadd.f32 %v2265_v59, %v2264_v63 }
0x1a2a   :  { %v2277_v3 = vrot.slane %v2276_v5, 1  ;;  %v2296_v16 = vsel %vm457_vm4, %v2266_v34, %v2295_v46 }
0x1a2b   :  { %v2297_v13 = vsel %vm459_vm5, %v2272_v51, %v2296_v16 }
0x1a2c   :  { %v2278_v20 = vadd.f32 %v2277_v3, %v2276_v5 }
0x1a2e   :  { %v2298_v22 = vsel %vm461_vm6, %v2278_v20, %v2297_v13 }
0x1a2f   :  { %v2299_v0 = vsel %vm463_vm7, %v2284_v55, %v2298_v22 }
0x1a30   :  { %v2301_v29 = vpack.c.bf16 %v2299_v0, %v2299_v0 }
0x1a32   :  { %2336 = vmatmul.mubr.bf16.vlgmr.msra.gmra.mrb[16].mxu0 %v2301_v29 }
0x1b05   :  { %v2640_v58 = vpop.f32.mrb[16].mxu0 }
0x1b06   :  { %v2641_v61 = vpop.f32.mrb[17].mxu0 }
0x1b07   :  { %v2642_v57 = vadd.f32 %v2641_v61, %v2640_v58  ;;  %v2643_v27 = vpop.f32.mrb[18].mxu0 }
0x1b08   :  { %v2644_v24 = vpop.f32.mrb[19].mxu0 }
0x1b09   :  { %v2338_v45 = vadd.f32 %v3609_v11, %v2642_v57 }
0x1b0b   :  { %v2343_v19 = vpack.c.bf16 %v2338_v45, %v2338_v45 }
0x1b0d   :  { %2696 = vmatmul.mubr.bf16.vlgmr.msra.gmra.mrb[12].mxu1 %v2343_v19 }
0x1be0   :  { %v2449_v39 = vpop.f32.mrb[12].mxu1 }
0x1be1   :  { %v2450_v33 = vadd.f32 %v2493_v9, %v2449_v39  ;;  %v2697_v18 = vpop.f32.mrb[13].mxu1 }
0x1be2   :  { %v2452_v49 = vpop.f32.mrb[14].mxu1 }
0x1be3   :  { %2455 = vst [vmem:[%s3786_s12] sm:$0xff] %v2450_v33  ;;  %v2698_v54 = vpop.f32.mrb[15].mxu1 }

</bundles_post_ra>
